<compile_context>
chip_gen: v6e
topology: v6e:2x2x1
jax: 0.10.0
libtpu: 0.0.40
codegen_flags: <defaults>
</compile_context>

<pallas_src>
import functools

import jax
import jax.numpy as jnp
from jax.experimental import pallas as pl
from jax.experimental.pallas import tpu as pltpu


def _round_up(x, m):
    return ((x + m - 1) // m) * m


# ----------------------------------------------------------------------------
# Fused forward kernel
# ----------------------------------------------------------------------------

def _san_fused_kernel(
    box_mask_ref,   # (B, N, HW)    bf16  0/1 ROI masks
    img_aug_ref,    # (B, C+1, HW)  bf16  image feats + ones row (ROI counts)
    adj_sum_ref,    # (B, N, N)     bf16  adjacency, R relation blocks pre-summed
    obj_mask_ref,   # (B, N)        f32   1.0 = padded object
    region_ref,     # (B, N, HW)    bf16  per-object region masks
    emb_ref,        # (B, T, Dw)    bf16  question word embeddings
    qlen_ref,       # (B, 1)        f32   question lengths
    gcn_w_ref,      # (2C, C)       bf16  stacked [Wn; Ws]
    gcn_b_ref,      # (1, C)        f32
    w_ih_ref,       # (Dw, 4H)      bf16  gate order (i,f,o,g)
    w_hh_ref,       # (H, 4H)       bf16  gate order (i,f,o,g)
    b_lstm_ref,     # (1, 4H)       f32   gate order (i,f,o,g)
    qproj_w_ref,    # (H, Din)      bf16
    qproj_b_ref,    # (1, Din)      f32
    oproj_w_ref,    # (C, Din)      bf16
    oproj_b_ref,    # (1, Din)      f32
    wi_ref,         # (Din, Dm)     bf16
    wq_ref,         # (Din, Dm)     bf16
    bq_ref,         # (1, Dm)       f32
    wp_ref,         # (1, Dm)       f32
    bp_ref,         # (1, 1)        f32  (SMEM scalar)
    ans_w_ref,      # (Din, n_ans)  bf16 weight-normed head (transposed)
    ans_b_ref,      # (1, n_ans)    f32
    out_ref,        # (B, 128 + 128 + HW) f32: [ans|0 | attn|0 | pred_attn_mask]
    *, n_attn_layers):
    f32 = jnp.float32
    bf16 = jnp.bfloat16

    B, N, HW = box_mask_ref.shape
    C = img_aug_ref.shape[1] - 1
    _, T, Dw = emb_ref.shape
    Hh = w_hh_ref.shape[0]
    Din = oproj_w_ref.shape[1]
    n_ans = ans_w_ref.shape[1]

    # ---- ROI pooling: masked mean; sums and counts from one lane-dense matmul
    # TODO(synk): roi_pooling_2d(3x3 max) + AvgPool2d(3x3) approximated as an
    # adaptive masked mean over each box.
    sums = jnp.einsum('bnk,bck->bnc', box_mask_ref[...], img_aug_ref[...],
                      preferred_element_type=f32)                 # (B, N, C+1)
    cnt = jnp.maximum(sums[..., C:C + 1], 1.0)                    # (B, N, 1)
    obj_feats = sums[..., :C] / cnt                               # exact divide

    # ---- GCN: ReLU([adj_sum @ obj | obj] @ [Wn; Ws] + b) ---------------------
    # TODO(synk): GCN source not provided; reconstructed standard formulation.
    agg = jnp.einsum('bij,bjc->bic', adj_sum_ref[...], obj_feats.astype(bf16),
                     preferred_element_type=f32)                  # (B, N, C)
    cat = jnp.concatenate([agg, obj_feats], axis=-1).astype(bf16)  # (B, N, 2C)
    gcn_obj = jnp.maximum(
        jnp.dot(cat.reshape(B * N, 2 * C), gcn_w_ref[...],
                preferred_element_type=f32).reshape(B, N, C)
        + gcn_b_ref[...][None], 0.0)                              # (B, N, C)

    # ---- object projection (NonLinearity = Linear + ReLU; dropout = identity)
    obj_proj = jnp.maximum(
        jnp.dot(gcn_obj.reshape(B * N, C).astype(bf16), oproj_w_ref[...],
                preferred_element_type=f32).reshape(B, N, Din)
        + oproj_b_ref[...][None], 0.0)                            # (B, N, Din)

    # ---- question LSTM ------------------------------------------------------
    # Input projection hoisted out of the serial loop: one matmul for all T.
    gx = (jnp.dot(emb_ref[...].reshape(B * T, Dw), w_ih_ref[...],
                  preferred_element_type=f32).reshape(B, T, 4 * Hh)
          + b_lstm_ref[...][None])                                # (B, T, 4H)
    ql = qlen_ref[...]                                            # (B, 1)
    w_hh = w_hh_ref[...]
    h = jnp.zeros((B, Hh), f32)
    c = jnp.zeros((B, Hh), f32)
    for t in range(T):  # static unroll; masked update == pack_padded_sequence
        gates = gx[:, t, :] + jnp.dot(h.astype(bf16), w_hh,
                                      preferred_element_type=f32)  # (B, 4H)
        sig = jax.nn.sigmoid(gates[:, :3 * Hh])                   # i,f,o merged
        i_g = sig[:, 0 * Hh:1 * Hh]
        f_g = sig[:, 1 * Hh:2 * Hh]
        o_g = sig[:, 2 * Hh:3 * Hh]
        g_g = jnp.tanh(gates[:, 3 * Hh:])
        c_new = f_g * c + i_g * g_g
        h_new = o_g * jnp.tanh(c_new)
        m = (ql > t).astype(f32)                                  # (B, 1)
        c = m * c_new + (1.0 - m) * c
        h = m * h_new + (1.0 - m) * h

    # ---- question projection -------------------------------------------------
    ques_emb = jnp.maximum(
        jnp.dot(h.astype(bf16), qproj_w_ref[...], preferred_element_type=f32)
        + qproj_b_ref[...], 0.0)                                  # (B, Din)

    # ---- stacked attention: both layers in-kernel, shared weights ------------
    # TODO(synk): StackedAttention source not provided; standard SAN update
    # (u^k = u^{k-1} + sum_n attn_n * v_n) reconstructed.
    hi = jnp.dot(obj_proj.reshape(B * N, Din).astype(bf16), wi_ref[...],
                 preferred_element_type=f32).reshape(B, N, -1)    # (B, N, Dm)
    pad = obj_mask_ref[...] > 0.5                                 # True = padded
    wp3 = wp_ref[...][None]                                       # (1, 1, Dm)
    bp = bp_ref[0, 0]                                             # SMEM scalar
    attn = None
    for _ in range(n_attn_layers):
        hq = jnp.dot(ques_emb.astype(bf16), wq_ref[...],
                     preferred_element_type=f32) + bq_ref[...]    # (B, Dm)
        hcomb = jnp.tanh(hi + hq[:, None, :])                     # (B, N, Dm)
        logits = jnp.sum(hcomb * wp3, axis=-1) + bp               # (B, N)
        logits = jnp.where(pad, -1e9, logits)
        attn = jax.nn.softmax(logits, axis=-1)                    # (B, N)
        attended = jnp.sum(attn[:, :, None] * obj_proj, axis=1)   # (B, Din)
        ques_emb = ques_emb + attended

    # pred_attn_mask only for the final layer (earlier ones are discarded)
    pmask = jnp.sum(attn[:, :, None] * region_ref[...], axis=1)   # (B, HW) f32

    # ---- weight-normalized answer head ---------------------------------------
    ans = (jnp.dot(ques_emb.astype(bf16), ans_w_ref[...],
                   preferred_element_type=f32) + ans_b_ref[...])  # (B, n_ans)

    # ---- single packed store; every segment starts on a 128-lane boundary ----
    seg_ans = _round_up(n_ans, 128)
    seg_attn = _round_up(N, 128)
    pieces = [ans]
    if seg_ans > n_ans:
        pieces.append(jnp.zeros((B, seg_ans - n_ans), f32))
    pieces.append(attn)
    if seg_attn > N:
        pieces.append(jnp.zeros((B, seg_attn - N), f32))
    pieces.append(pmask)
    out_ref[...] = jnp.concatenate(pieces, axis=-1)


# ----------------------------------------------------------------------------
# Parameter construction (deterministic, synthetic)
# ----------------------------------------------------------------------------

CFG = dict(
    batch=2,
    n_img_feats=32,          # image feature channels
    H=16, W=16,              # image spatial size
    max_num_objs=8,
    max_rels=4,
    max_ques_len=8,
    ques_vocab_sz=50,
    ques_word_vec_dim=16,
    n_ques_emb=32,           # LSTM hidden
    san_dim_in=32,
    san_dim_mid=32,
    n_ans=10,
    n_attn_layers=2,
)


def init_params(key, cfg):
    ks = jax.random.split(key, 16)
    C = cfg["n_img_feats"]
    H = cfg["n_ques_emb"]
    Dw = cfg["ques_word_vec_dim"]
    Din = cfg["san_dim_in"]
    Dm = cfg["san_dim_mid"]

    def rnd(k, shape, scale=0.1):
        return scale * jax.random.normal(k, shape, dtype=jnp.float32)

    params = dict(
        # GCN (neighbor + self transforms)
        gcn_wn=rnd(ks[0], (C, C)),
        gcn_ws=rnd(ks[1], (C, C)),
        gcn_b=rnd(ks[2], (1, C)),
        # Question encoder: embedding + single-layer LSTM (PyTorch gate order i,f,g,o)
        embed=rnd(ks[3], (cfg["ques_vocab_sz"], Dw), 0.5),
        w_ih=rnd(ks[4], (Dw, 4 * H)),
        w_hh=rnd(ks[5], (H, 4 * H)),
        b_lstm=rnd(ks[6], (1, 4 * H)),
        # NonLinearity projections (Linear + ReLU; dropout is identity in eval)
        ques_proj_w=rnd(ks[7], (H, Din)),
        ques_proj_b=rnd(ks[8], (1, Din)),
        obj_proj_w=rnd(ks[9], (C, Din)),
        obj_proj_b=rnd(ks[10], (1, Din)),
        # StackedAttention (nn.ModuleList([layer]*n) shares weights -> one set)
        attn_wi=rnd(ks[11], (Din, Dm)),
        attn_wq=rnd(ks[12], (Din, Dm)),
        attn_bq=rnd(ks[13], (1, Dm)),
        attn_wp=rnd(ks[14], (1, Dm)),
        attn_bp=jnp.zeros((1, 1), jnp.float32),
        # weight-normed answer head
        ans_v=rnd(ks[15], (cfg["n_ans"], Din)),
        ans_g=jnp.ones((cfg["n_ans"],), jnp.float32),
        ans_b=jnp.zeros((cfg["n_ans"],), jnp.float32),
    )
    # weight_norm init: g = ||v|| row-wise (so w == v initially)
    params["ans_g"] = jnp.linalg.norm(params["ans_v"], axis=1)
    return params


# ----------------------------------------------------------------------------
# SAN forward (layout prep in JAX, all compute in one Pallas kernel)
# ----------------------------------------------------------------------------

def san_forward(params, cfg, img_feats, ques, objs, adj_mat, ques_lens, num_obj,
                obj_wrds, obj_region_mask):
    del obj_wrds  # use_rel_words=False
    f32, bf16 = jnp.float32, jnp.bfloat16

    B, C, H, W = img_feats.shape
    N = objs.shape[1]
    T = ques.shape[1]
    HW = H * W
    n_ans = params["ans_b"].shape[0]
    n_layers = cfg["n_attn_layers"]
    seg_ans = _round_up(n_ans, 128)
    seg_attn = _round_up(N, 128)
    out_w = seg_ans + seg_attn + HW

    # ---- ROI box masks (elementwise prep for the in-kernel masked-mean) -----
    xs = jnp.arange(W, dtype=f32)[None, None, None, :]
    ys = jnp.arange(H, dtype=f32)[None, None, :, None]
    x1 = objs[..., 0][:, :, None, None]
    y1 = objs[..., 1][:, :, None, None]
    x2 = objs[..., 2][:, :, None, None]
    y2 = objs[..., 3][:, :, None, None]
    box_mask = ((xs >= x1) & (xs <= x2) & (ys >= y1) & (ys <= y2))
    box_mask = box_mask.reshape(B, N, HW).astype(bf16)

    # image feats -> (B, C+1, HW): HW on the lane axis (lane-dense), plus a
    # ones row so ROI sums and counts come out of a single matmul in-kernel.
    img_flat = img_feats.reshape(B, C, HW)
    img_aug = jnp.concatenate([img_flat, jnp.ones((B, 1, HW), f32)],
                              axis=1).astype(bf16)

    # adjacency dedup: adj @ tile(obj, R) == (sum of R relation blocks) @ obj.
    R = adj_mat.shape[2] // N
    adj_sum = adj_mat.reshape(B, N, R, N).sum(axis=2).astype(bf16)

    obj_mask = (jnp.arange(N)[None, :] >= num_obj[:, None]).astype(f32)
    region_flat = obj_region_mask.reshape(B, N, HW).astype(bf16)  # 0/1 mask

    # question embedding (B, T, Dw); ques_lens as a (B,1) vector (the per-step
    # packed-sequence mask is built in-kernel with one compare per step).
    emb_seq = jnp.take(params["embed"], ques, axis=0).astype(bf16)  # (B, T, Dw)
    qlen = ques_lens.astype(f32)[:, None]                           # (B, 1)

    # stacked GCN weight.
    gcn_w = jnp.concatenate([params["gcn_wn"], params["gcn_ws"]],
                            axis=0).astype(bf16)                  # (2C, C)

    # LSTM gate reorder (i,f,g,o) -> (i,f,o,g): kernel then runs one sigmoid
    # over the first 3H gate columns and one tanh over the last H.
    def _reorder_gates(w):
        i, f, g, o = jnp.split(w, 4, axis=-1)
        return jnp.concatenate([i, f, o, g], axis=-1)
    w_ih = _reorder_gates(params["w_ih"]).astype(bf16)
    w_hh = _reorder_gates(params["w_hh"]).astype(bf16)
    b_lstm = _reorder_gates(params["b_lstm"])

    # weight-normed answer head (tiny XLA prep).
    v, g = params["ans_v"], params["ans_g"]
    w_norm = (g / jnp.maximum(jnp.linalg.norm(v, axis=1), 1e-12))[:, None] * v
    ans_w = w_norm.T.astype(bf16)                                 # (Din, n_ans)
    ans_b = params["ans_b"][None, :]                              # (1, n_ans)

    vmem = pl.BlockSpec(memory_space=pltpu.MemorySpace.VMEM)
    smem = pl.BlockSpec(memory_space=pltpu.MemorySpace.SMEM)
    operands = [
        (box_mask, vmem), (img_aug, vmem), (adj_sum, vmem), (obj_mask, vmem),
        (region_flat, vmem), (emb_seq, vmem), (qlen, vmem),
        (gcn_w, vmem), (params["gcn_b"], vmem),
        (w_ih, vmem), (w_hh, vmem), (b_lstm, vmem),
        (params["ques_proj_w"].astype(bf16), vmem), (params["ques_proj_b"], vmem),
        (params["obj_proj_w"].astype(bf16), vmem), (params["obj_proj_b"], vmem),
        (params["attn_wi"].astype(bf16), vmem),
        (params["attn_wq"].astype(bf16), vmem),
        (params["attn_bq"], vmem), (params["attn_wp"], vmem),
        (params["attn_bp"], smem),           # (1,1) scalar bias via SMEM
        (ans_w, vmem), (ans_b, vmem),
    ]
    arrays, in_specs = zip(*operands)

    # TODO(synk): at production sizes add a batch grid with
    # dimension_semantics=("parallel",) so v7x's second TensorCore is used, and
    # give the big per-example operands (box_mask, img_aug, region_flat) tiled
    # BlockSpecs sized against v7x's 64 MiB VMEM to restore DMA/compute overlap.
    out = pl.pallas_call(
        functools.partial(_san_fused_kernel, n_attn_layers=n_layers),
        out_shape=jax.ShapeDtypeStruct((B, out_w), f32),
        in_specs=list(in_specs),
        out_specs=vmem,
    )(*arrays)

    ans = out[:, :n_ans]
    attn_wt = out[:, seg_ans:seg_ans + N]
    pred_attn_mask = out[:, seg_ans + seg_attn:seg_ans + seg_attn + HW]
    return ans, pred_attn_mask, attn_wt


# ----------------------------------------------------------------------------
# Main
# ----------------------------------------------------------------------------

if __name__ == "__main__":
    cfg = CFG
    key = jax.random.PRNGKey(0)
    kp, k1, k2, k3, k4, k5, k6 = jax.random.split(key, 7)

    params = init_params(kp, cfg)

    B = cfg["batch"]
    C = cfg["n_img_feats"]
    H, W = cfg["H"], cfg["W"]
    N = cfg["max_num_objs"]
    R = cfg["max_rels"]
    T = cfg["max_ques_len"]

    img_feats = jax.random.normal(k1, (B, C, H, W), dtype=jnp.float32)   # NCHW
    ques = jax.random.randint(k2, (B, T), 0, cfg["ques_vocab_sz"])
    # object boxes (x1, y1, x2, y2) with x2 >= x1, y2 >= y1 inside the image
    tl = jax.random.randint(k3, (B, N, 2), 0, H // 2).astype(jnp.float32)
    ext = jax.random.randint(k4, (B, N, 2), 2, H // 2).astype(jnp.float32)
    br = jnp.clip(tl + ext, 0, H - 1)
    objs = jnp.concatenate([tl, br], axis=-1)                            # (B, N, 4)
    adj_mat = jax.random.bernoulli(k5, 0.3, (B, N, N * R)).astype(jnp.float32)
    ques_lens = jnp.array([T, T - 2], dtype=jnp.int32)
    num_obj = jnp.array([N, N - 3], dtype=jnp.int32)
    obj_wrds = jnp.zeros((B, N), dtype=jnp.int32)
    obj_region_mask = jax.random.bernoulli(k6, 0.5, (B, N, H, W)).astype(jnp.float32)

    forward = jax.jit(lambda p, *xs: san_forward(p, cfg, *xs))
    ans, pred_attn_mask, attn_wt = forward(
        params, img_feats, ques, objs, adj_mat, ques_lens, num_obj,
        obj_wrds, obj_region_mask)

    jax.block_until_ready((ans, pred_attn_mask, attn_wt))
    assert ans.shape == (B, cfg["n_ans"])
    assert pred_attn_mask.shape == (B, H * W)
    assert attn_wt.shape == (B, N)
    assert bool(jnp.all(jnp.isfinite(ans)))
    assert bool(jnp.all(jnp.abs(jnp.sum(attn_wt, axis=-1) - 1.0) < 1e-3))
    print("KERNEL_OK")
</pallas_src>

<mosaic_0001>
module attributes {stable_mosaic.version = 11 : i64} {
  func.func @_san_fused_kernel(%arg0: memref<2x8x256xbf16, #tpu.memory_space<vmem>>, %arg1: memref<2x33x256xbf16, #tpu.memory_space<vmem>>, %arg2: memref<2x8x8xbf16, #tpu.memory_space<vmem>>, %arg3: memref<2x8xf32, #tpu.memory_space<vmem>>, %arg4: memref<2x8x256xbf16, #tpu.memory_space<vmem>>, %arg5: memref<2x8x16xbf16, #tpu.memory_space<vmem>>, %arg6: memref<2x1xf32, #tpu.memory_space<vmem>>, %arg7: memref<64x32xbf16, #tpu.memory_space<vmem>>, %arg8: memref<1x32xf32, #tpu.memory_space<vmem>>, %arg9: memref<16x128xbf16, #tpu.memory_space<vmem>>, %arg10: memref<32x128xbf16, #tpu.memory_space<vmem>>, %arg11: memref<1x128xf32, #tpu.memory_space<vmem>>, %arg12: memref<32x32xbf16, #tpu.memory_space<vmem>>, %arg13: memref<1x32xf32, #tpu.memory_space<vmem>>, %arg14: memref<32x32xbf16, #tpu.memory_space<vmem>>, %arg15: memref<1x32xf32, #tpu.memory_space<vmem>>, %arg16: memref<32x32xbf16, #tpu.memory_space<vmem>>, %arg17: memref<32x32xbf16, #tpu.memory_space<vmem>>, %arg18: memref<1x32xf32, #tpu.memory_space<vmem>>, %arg19: memref<1x32xf32, #tpu.memory_space<vmem>>, %arg20: memref<1x1xf32, #tpu.memory_space<smem>>, %arg21: memref<32x10xbf16, #tpu.memory_space<vmem>>, %arg22: memref<1x10xf32, #tpu.memory_space<vmem>>, %arg23: memref<2x512xf32, #tpu.memory_space<vmem>>) attributes {dimension_semantics = [], scalar_prefetch = 0 : i64, scratch_operands = 0 : i64, tpu.core_type = #tpu.core_type<tc>} {
    %c0 = arith.constant 0 : index
    %c0_0 = arith.constant 0 : index
    %c0_1 = arith.constant 0 : index
    %0 = vector.load %arg0[%c0, %c0_0, %c0_1] : memref<2x8x256xbf16, #tpu.memory_space<vmem>>, vector<2x8x256xbf16>
    %c0_2 = arith.constant 0 : index
    %c0_3 = arith.constant 0 : index
    %c0_4 = arith.constant 0 : index
    %1 = vector.load %arg1[%c0_2, %c0_3, %c0_4] : memref<2x33x256xbf16, #tpu.memory_space<vmem>>, vector<2x33x256xbf16>
    "tpu.trace_start"() <{level = 10 : i32, message = "bnk,bck->bnc"}> : () -> ()
    %cst = arith.constant dense<0.000000e+00> : vector<2x8x33xf32>
    %2 = tpu.matmul %0, %1, %cst {dimension_numbers = #tpu.dot_dimension_numbers<[2], [2], [1], [1], [0, 0, 0, 1, 1, 1], [0], [0]>} : vector<2x8x256xbf16>, vector<2x33x256xbf16>, vector<2x8x33xf32> -> vector<2x8x33xf32>
    "tpu.trace_stop"() : () -> ()
    %3 = vector.extract_strided_slice %2 {offsets = [0, 0, 32], sizes = [2, 8, 1], strides = [1, 1, 1]} : vector<2x8x33xf32> to vector<2x8x1xf32>
    %cst_5 = arith.constant 1.000000e+00 : f32
    %4 = vector.broadcast %cst_5 : f32 to vector<2x8x1xf32>
    %5 = arith.maximumf %3, %4 : vector<2x8x1xf32>
    %6 = vector.extract_strided_slice %2 {offsets = [0, 0, 0], sizes = [2, 8, 32], strides = [1, 1, 1]} : vector<2x8x33xf32> to vector<2x8x32xf32>
    %7 = vector.broadcast %5 : vector<2x8x1xf32> to vector<2x8x32xf32>
    %8 = arith.divf %6, %7 : vector<2x8x32xf32>
    %c0_6 = arith.constant 0 : index
    %c0_7 = arith.constant 0 : index
    %c0_8 = arith.constant 0 : index
    %9 = vector.load %arg2[%c0_6, %c0_7, %c0_8] : memref<2x8x8xbf16, #tpu.memory_space<vmem>>, vector<2x8x8xbf16>
    %10 = arith.truncf %8 : vector<2x8x32xf32> to vector<2x8x32xbf16>
    "tpu.trace_start"() <{level = 10 : i32, message = "bij,bjc->bic"}> : () -> ()
    %cst_9 = arith.constant dense<0.000000e+00> : vector<2x8x32xf32>
    %11 = tpu.matmul %9, %10, %cst_9 {dimension_numbers = #tpu.dot_dimension_numbers<[2], [1], [1], [2], [0, 0, 0, 1, 1, 2], [0], [0]>} : vector<2x8x8xbf16>, vector<2x8x32xbf16>, vector<2x8x32xf32> -> vector<2x8x32xf32>
    "tpu.trace_stop"() : () -> ()
    %12 = tpu.concatenate %11, %8 in 2 : vector<2x8x32xf32>, vector<2x8x32xf32> -> vector<2x8x64xf32>
    %13 = arith.truncf %12 : vector<2x8x64xf32> to vector<2x8x64xbf16>
    %14 = vector.shape_cast %13 : vector<2x8x64xbf16> to vector<16x64xbf16>
    %c0_10 = arith.constant 0 : index
    %c0_11 = arith.constant 0 : index
    %15 = vector.load %arg7[%c0_10, %c0_11] : memref<64x32xbf16, #tpu.memory_space<vmem>>, vector<64x32xbf16>
    %cst_12 = arith.constant dense<0.000000e+00> : vector<16x32xf32>
    %16 = tpu.matmul %14, %15, %cst_12 {dimension_numbers = #tpu.dot_dimension_numbers<[1], [0], [0], [1], [0, 0, 1, 1], [], []>} : vector<16x64xbf16>, vector<64x32xbf16>, vector<16x32xf32> -> vector<16x32xf32>
    %17 = vector.shape_cast %16 : vector<16x32xf32> to vector<2x8x32xf32>
    %c0_13 = arith.constant 0 : index
    %c0_14 = arith.constant 0 : index
    %18 = vector.load %arg8[%c0_13, %c0_14] : memref<1x32xf32, #tpu.memory_space<vmem>>, vector<1x32xf32>
    %19 = vector.shape_cast %18 : vector<1x32xf32> to vector<1x1x32xf32>
    %20 = vector.broadcast %19 : vector<1x1x32xf32> to vector<2x8x32xf32>
    %21 = arith.addf %17, %20 : vector<2x8x32xf32>
    %cst_15 = arith.constant 0.000000e+00 : f32
    %22 = vector.broadcast %cst_15 : f32 to vector<2x8x32xf32>
    %23 = arith.maximumf %21, %22 : vector<2x8x32xf32>
    %24 = vector.shape_cast %23 : vector<2x8x32xf32> to vector<16x32xf32>
    %25 = arith.truncf %24 : vector<16x32xf32> to vector<16x32xbf16>
    %c0_16 = arith.constant 0 : index
    %c0_17 = arith.constant 0 : index
    %26 = vector.load %arg14[%c0_16, %c0_17] : memref<32x32xbf16, #tpu.memory_space<vmem>>, vector<32x32xbf16>
    %cst_18 = arith.constant dense<0.000000e+00> : vector<16x32xf32>
    %27 = tpu.matmul %25, %26, %cst_18 {dimension_numbers = #tpu.dot_dimension_numbers<[1], [0], [0], [1], [0, 0, 1, 1], [], []>} : vector<16x32xbf16>, vector<32x32xbf16>, vector<16x32xf32> -> vector<16x32xf32>
    %28 = vector.shape_cast %27 : vector<16x32xf32> to vector<2x8x32xf32>
    %c0_19 = arith.constant 0 : index
    %c0_20 = arith.constant 0 : index
    %29 = vector.load %arg15[%c0_19, %c0_20] : memref<1x32xf32, #tpu.memory_space<vmem>>, vector<1x32xf32>
    %30 = vector.shape_cast %29 : vector<1x32xf32> to vector<1x1x32xf32>
    %31 = vector.broadcast %30 : vector<1x1x32xf32> to vector<2x8x32xf32>
    %32 = arith.addf %28, %31 : vector<2x8x32xf32>
    %cst_21 = arith.constant 0.000000e+00 : f32
    %33 = vector.broadcast %cst_21 : f32 to vector<2x8x32xf32>
    %34 = arith.maximumf %32, %33 : vector<2x8x32xf32>
    %c0_22 = arith.constant 0 : index
    %c0_23 = arith.constant 0 : index
    %c0_24 = arith.constant 0 : index
    %35 = vector.load %arg5[%c0_22, %c0_23, %c0_24] : memref<2x8x16xbf16, #tpu.memory_space<vmem>>, vector<2x8x16xbf16>
    %36 = vector.shape_cast %35 : vector<2x8x16xbf16> to vector<16x16xbf16>
    %c0_25 = arith.constant 0 : index
    %c0_26 = arith.constant 0 : index
    %37 = vector.load %arg9[%c0_25, %c0_26] : memref<16x128xbf16, #tpu.memory_space<vmem>>, vector<16x128xbf16>
    %cst_27 = arith.constant dense<0.000000e+00> : vector<16x128xf32>
    %38 = tpu.matmul %36, %37, %cst_27 {dimension_numbers = #tpu.dot_dimension_numbers<[1], [0], [0], [1], [0, 0, 1, 1], [], []>} : vector<16x16xbf16>, vector<16x128xbf16>, vector<16x128xf32> -> vector<16x128xf32>
    %39 = vector.shape_cast %38 : vector<16x128xf32> to vector<2x8x128xf32>
    %c0_28 = arith.constant 0 : index
    %c0_29 = arith.constant 0 : index
    %40 = vector.load %arg11[%c0_28, %c0_29] : memref<1x128xf32, #tpu.memory_space<vmem>>, vector<1x128xf32>
    %41 = vector.shape_cast %40 : vector<1x128xf32> to vector<1x1x128xf32>
    %42 = vector.broadcast %41 : vector<1x1x128xf32> to vector<2x8x128xf32>
    %43 = arith.addf %39, %42 : vector<2x8x128xf32>
    %c0_30 = arith.constant 0 : index
    %c0_31 = arith.constant 0 : index
    %44 = vector.load %arg6[%c0_30, %c0_31] : memref<2x1xf32, #tpu.memory_space<vmem>>, vector<2x1xf32>
    %c0_32 = arith.constant 0 : index
    %c0_33 = arith.constant 0 : index
    %45 = vector.load %arg10[%c0_32, %c0_33] : memref<32x128xbf16, #tpu.memory_space<vmem>>, vector<32x128xbf16>
    %cst_34 = arith.constant 0.000000e+00 : f32
    %46 = vector.broadcast %cst_34 : f32 to vector<2x32xf32>
    %cst_35 = arith.constant 0.000000e+00 : f32
    %47 = vector.broadcast %cst_35 : f32 to vector<2x32xf32>
    %48 = vector.extract_strided_slice %43 {offsets = [0, 0, 0], sizes = [2, 1, 128], strides = [1, 1, 1]} : vector<2x8x128xf32> to vector<2x1x128xf32>
    %49 = vector.shape_cast %48 : vector<2x1x128xf32> to vector<2x128xf32>
    %50 = arith.truncf %46 : vector<2x32xf32> to vector<2x32xbf16>
    %cst_36 = arith.constant dense<0.000000e+00> : vector<2x128xf32>
    %51 = tpu.matmul %50, %45, %cst_36 {dimension_numbers = #tpu.dot_dimension_numbers<[1], [0], [0], [1], [0, 0, 1, 1], [], []>} : vector<2x32xbf16>, vector<32x128xbf16>, vector<2x128xf32> -> vector<2x128xf32>
    %52 = arith.addf %49, %51 : vector<2x128xf32>
    %53 = vector.extract_strided_slice %52 {offsets = [0, 0], sizes = [2, 96], strides = [1, 1]} : vector<2x128xf32> to vector<2x96xf32>
    %54 = arith.negf %53 : vector<2x96xf32>
    %55 = math.exp %54 : vector<2x96xf32>
    %cst_37 = arith.constant 1.000000e+00 : f32
    %56 = vector.broadcast %cst_37 : f32 to vector<2x96xf32>
    %57 = arith.addf %56, %55 : vector<2x96xf32>
    %58 = arith.divf %56, %57 : vector<2x96xf32>
    %59 = vector.extract_strided_slice %58 {offsets = [0, 0], sizes = [2, 32], strides = [1, 1]} : vector<2x96xf32> to vector<2x32xf32>
    %60 = vector.extract_strided_slice %58 {offsets = [0, 32], sizes = [2, 32], strides = [1, 1]} : vector<2x96xf32> to vector<2x32xf32>
    %61 = vector.extract_strided_slice %58 {offsets = [0, 64], sizes = [2, 32], strides = [1, 1]} : vector<2x96xf32> to vector<2x32xf32>
    %62 = vector.extract_strided_slice %52 {offsets = [0, 96], sizes = [2, 32], strides = [1, 1]} : vector<2x128xf32> to vector<2x32xf32>
    %63 = math.tanh %62 : vector<2x32xf32>
    %64 = arith.mulf %60, %47 : vector<2x32xf32>
    %65 = arith.mulf %59, %63 : vector<2x32xf32>
    %66 = arith.addf %64, %65 : vector<2x32xf32>
    %67 = math.tanh %66 : vector<2x32xf32>
    %68 = arith.mulf %61, %67 : vector<2x32xf32>
    %cst_38 = arith.constant 0.000000e+00 : f32
    %69 = vector.broadcast %cst_38 : f32 to vector<2x1xf32>
    %70 = arith.cmpf ogt, %44, %69 : vector<2x1xf32>
    %71 = arith.extui %70 : vector<2x1xi1> to vector<2x1xi32>
    %72 = arith.sitofp %71 : vector<2x1xi32> to vector<2x1xf32>
    %73 = vector.broadcast %72 : vector<2x1xf32> to vector<2x32xf32>
    %74 = arith.mulf %73, %66 : vector<2x32xf32>
    %cst_39 = arith.constant 1.000000e+00 : f32
    %75 = vector.broadcast %cst_39 : f32 to vector<2x1xf32>
    %76 = arith.subf %75, %72 : vector<2x1xf32>
    %77 = vector.broadcast %76 : vector<2x1xf32> to vector<2x32xf32>
    %78 = arith.mulf %77, %47 : vector<2x32xf32>
    %79 = arith.addf %74, %78 : vector<2x32xf32>
    %80 = vector.broadcast %72 : vector<2x1xf32> to vector<2x32xf32>
    %81 = arith.mulf %80, %68 : vector<2x32xf32>
    %cst_40 = arith.constant 1.000000e+00 : f32
    %82 = vector.broadcast %cst_40 : f32 to vector<2x1xf32>
    %83 = arith.subf %82, %72 : vector<2x1xf32>
    %84 = vector.broadcast %83 : vector<2x1xf32> to vector<2x32xf32>
    %85 = arith.mulf %84, %46 : vector<2x32xf32>
    %86 = arith.addf %81, %85 : vector<2x32xf32>
    %87 = vector.extract_strided_slice %43 {offsets = [0, 1, 0], sizes = [2, 1, 128], strides = [1, 1, 1]} : vector<2x8x128xf32> to vector<2x1x128xf32>
    %88 = vector.shape_cast %87 : vector<2x1x128xf32> to vector<2x128xf32>
    %89 = arith.truncf %86 : vector<2x32xf32> to vector<2x32xbf16>
    %cst_41 = arith.constant dense<0.000000e+00> : vector<2x128xf32>
    %90 = tpu.matmul %89, %45, %cst_41 {dimension_numbers = #tpu.dot_dimension_numbers<[1], [0], [0], [1], [0, 0, 1, 1], [], []>} : vector<2x32xbf16>, vector<32x128xbf16>, vector<2x128xf32> -> vector<2x128xf32>
    %91 = arith.addf %88, %90 : vector<2x128xf32>
    %92 = vector.extract_strided_slice %91 {offsets = [0, 0], sizes = [2, 96], strides = [1, 1]} : vector<2x128xf32> to vector<2x96xf32>
    %93 = arith.negf %92 : vector<2x96xf32>
    %94 = math.exp %93 : vector<2x96xf32>
    %cst_42 = arith.constant 1.000000e+00 : f32
    %95 = vector.broadcast %cst_42 : f32 to vector<2x96xf32>
    %96 = arith.addf %95, %94 : vector<2x96xf32>
    %97 = arith.divf %95, %96 : vector<2x96xf32>
    %98 = vector.extract_strided_slice %97 {offsets = [0, 0], sizes = [2, 32], strides = [1, 1]} : vector<2x96xf32> to vector<2x32xf32>
    %99 = vector.extract_strided_slice %97 {offsets = [0, 32], sizes = [2, 32], strides = [1, 1]} : vector<2x96xf32> to vector<2x32xf32>
    %100 = vector.extract_strided_slice %97 {offsets = [0, 64], sizes = [2, 32], strides = [1, 1]} : vector<2x96xf32> to vector<2x32xf32>
    %101 = vector.extract_strided_slice %91 {offsets = [0, 96], sizes = [2, 32], strides = [1, 1]} : vector<2x128xf32> to vector<2x32xf32>
    %102 = math.tanh %101 : vector<2x32xf32>
    %103 = arith.mulf %99, %79 : vector<2x32xf32>
    %104 = arith.mulf %98, %102 : vector<2x32xf32>
    %105 = arith.addf %103, %104 : vector<2x32xf32>
    %106 = math.tanh %105 : vector<2x32xf32>
    %107 = arith.mulf %100, %106 : vector<2x32xf32>
    %cst_43 = arith.constant 1.000000e+00 : f32
    %108 = vector.broadcast %cst_43 : f32 to vector<2x1xf32>
    %109 = arith.cmpf ogt, %44, %108 : vector<2x1xf32>
    %110 = arith.extui %109 : vector<2x1xi1> to vector<2x1xi32>
    %111 = arith.sitofp %110 : vector<2x1xi32> to vector<2x1xf32>
    %112 = vector.broadcast %111 : vector<2x1xf32> to vector<2x32xf32>
    %113 = arith.mulf %112, %105 : vector<2x32xf32>
    %cst_44 = arith.constant 1.000000e+00 : f32
    %114 = vector.broadcast %cst_44 : f32 to vector<2x1xf32>
    %115 = arith.subf %114, %111 : vector<2x1xf32>
    %116 = vector.broadcast %115 : vector<2x1xf32> to vector<2x32xf32>
    %117 = arith.mulf %116, %79 : vector<2x32xf32>
    %118 = arith.addf %113, %117 : vector<2x32xf32>
    %119 = vector.broadcast %111 : vector<2x1xf32> to vector<2x32xf32>
    %120 = arith.mulf %119, %107 : vector<2x32xf32>
    %cst_45 = arith.constant 1.000000e+00 : f32
    %121 = vector.broadcast %cst_45 : f32 to vector<2x1xf32>
    %122 = arith.subf %121, %111 : vector<2x1xf32>
    %123 = vector.broadcast %122 : vector<2x1xf32> to vector<2x32xf32>
    %124 = arith.mulf %123, %86 : vector<2x32xf32>
    %125 = arith.addf %120, %124 : vector<2x32xf32>
    %126 = vector.extract_strided_slice %43 {offsets = [0, 2, 0], sizes = [2, 1, 128], strides = [1, 1, 1]} : vector<2x8x128xf32> to vector<2x1x128xf32>
    %127 = vector.shape_cast %126 : vector<2x1x128xf32> to vector<2x128xf32>
    %128 = arith.truncf %125 : vector<2x32xf32> to vector<2x32xbf16>
    %cst_46 = arith.constant dense<0.000000e+00> : vector<2x128xf32>
    %129 = tpu.matmul %128, %45, %cst_46 {dimension_numbers = #tpu.dot_dimension_numbers<[1], [0], [0], [1], [0, 0, 1, 1], [], []>} : vector<2x32xbf16>, vector<32x128xbf16>, vector<2x128xf32> -> vector<2x128xf32>
    %130 = arith.addf %127, %129 : vector<2x128xf32>
    %131 = vector.extract_strided_slice %130 {offsets = [0, 0], sizes = [2, 96], strides = [1, 1]} : vector<2x128xf32> to vector<2x96xf32>
    %132 = arith.negf %131 : vector<2x96xf32>
    %133 = math.exp %132 : vector<2x96xf32>
    %cst_47 = arith.constant 1.000000e+00 : f32
    %134 = vector.broadcast %cst_47 : f32 to vector<2x96xf32>
    %135 = arith.addf %134, %133 : vector<2x96xf32>
    %136 = arith.divf %134, %135 : vector<2x96xf32>
    %137 = vector.extract_strided_slice %136 {offsets = [0, 0], sizes = [2, 32], strides = [1, 1]} : vector<2x96xf32> to vector<2x32xf32>
    %138 = vector.extract_strided_slice %136 {offsets = [0, 32], sizes = [2, 32], strides = [1, 1]} : vector<2x96xf32> to vector<2x32xf32>
    %139 = vector.extract_strided_slice %136 {offsets = [0, 64], sizes = [2, 32], strides = [1, 1]} : vector<2x96xf32> to vector<2x32xf32>
    %140 = vector.extract_strided_slice %130 {offsets = [0, 96], sizes = [2, 32], strides = [1, 1]} : vector<2x128xf32> to vector<2x32xf32>
    %141 = math.tanh %140 : vector<2x32xf32>
    %142 = arith.mulf %138, %118 : vector<2x32xf32>
    %143 = arith.mulf %137, %141 : vector<2x32xf32>
    %144 = arith.addf %142, %143 : vector<2x32xf32>
    %145 = math.tanh %144 : vector<2x32xf32>
    %146 = arith.mulf %139, %145 : vector<2x32xf32>
    %cst_48 = arith.constant 2.000000e+00 : f32
    %147 = vector.broadcast %cst_48 : f32 to vector<2x1xf32>
    %148 = arith.cmpf ogt, %44, %147 : vector<2x1xf32>
    %149 = arith.extui %148 : vector<2x1xi1> to vector<2x1xi32>
    %150 = arith.sitofp %149 : vector<2x1xi32> to vector<2x1xf32>
    %151 = vector.broadcast %150 : vector<2x1xf32> to vector<2x32xf32>
    %152 = arith.mulf %151, %144 : vector<2x32xf32>
    %cst_49 = arith.constant 1.000000e+00 : f32
    %153 = vector.broadcast %cst_49 : f32 to vector<2x1xf32>
    %154 = arith.subf %153, %150 : vector<2x1xf32>
    %155 = vector.broadcast %154 : vector<2x1xf32> to vector<2x32xf32>
    %156 = arith.mulf %155, %118 : vector<2x32xf32>
    %157 = arith.addf %152, %156 : vector<2x32xf32>
    %158 = vector.broadcast %150 : vector<2x1xf32> to vector<2x32xf32>
    %159 = arith.mulf %158, %146 : vector<2x32xf32>
    %cst_50 = arith.constant 1.000000e+00 : f32
    %160 = vector.broadcast %cst_50 : f32 to vector<2x1xf32>
    %161 = arith.subf %160, %150 : vector<2x1xf32>
    %162 = vector.broadcast %161 : vector<2x1xf32> to vector<2x32xf32>
    %163 = arith.mulf %162, %125 : vector<2x32xf32>
    %164 = arith.addf %159, %163 : vector<2x32xf32>
    %165 = vector.extract_strided_slice %43 {offsets = [0, 3, 0], sizes = [2, 1, 128], strides = [1, 1, 1]} : vector<2x8x128xf32> to vector<2x1x128xf32>
    %166 = vector.shape_cast %165 : vector<2x1x128xf32> to vector<2x128xf32>
    %167 = arith.truncf %164 : vector<2x32xf32> to vector<2x32xbf16>
    %cst_51 = arith.constant dense<0.000000e+00> : vector<2x128xf32>
    %168 = tpu.matmul %167, %45, %cst_51 {dimension_numbers = #tpu.dot_dimension_numbers<[1], [0], [0], [1], [0, 0, 1, 1], [], []>} : vector<2x32xbf16>, vector<32x128xbf16>, vector<2x128xf32> -> vector<2x128xf32>
    %169 = arith.addf %166, %168 : vector<2x128xf32>
    %170 = vector.extract_strided_slice %169 {offsets = [0, 0], sizes = [2, 96], strides = [1, 1]} : vector<2x128xf32> to vector<2x96xf32>
    %171 = arith.negf %170 : vector<2x96xf32>
    %172 = math.exp %171 : vector<2x96xf32>
    %cst_52 = arith.constant 1.000000e+00 : f32
    %173 = vector.broadcast %cst_52 : f32 to vector<2x96xf32>
    %174 = arith.addf %173, %172 : vector<2x96xf32>
    %175 = arith.divf %173, %174 : vector<2x96xf32>
    %176 = vector.extract_strided_slice %175 {offsets = [0, 0], sizes = [2, 32], strides = [1, 1]} : vector<2x96xf32> to vector<2x32xf32>
    %177 = vector.extract_strided_slice %175 {offsets = [0, 32], sizes = [2, 32], strides = [1, 1]} : vector<2x96xf32> to vector<2x32xf32>
    %178 = vector.extract_strided_slice %175 {offsets = [0, 64], sizes = [2, 32], strides = [1, 1]} : vector<2x96xf32> to vector<2x32xf32>
    %179 = vector.extract_strided_slice %169 {offsets = [0, 96], sizes = [2, 32], strides = [1, 1]} : vector<2x128xf32> to vector<2x32xf32>
    %180 = math.tanh %179 : vector<2x32xf32>
    %181 = arith.mulf %177, %157 : vector<2x32xf32>
    %182 = arith.mulf %176, %180 : vector<2x32xf32>
    %183 = arith.addf %181, %182 : vector<2x32xf32>
    %184 = math.tanh %183 : vector<2x32xf32>
    %185 = arith.mulf %178, %184 : vector<2x32xf32>
    %cst_53 = arith.constant 3.000000e+00 : f32
    %186 = vector.broadcast %cst_53 : f32 to vector<2x1xf32>
    %187 = arith.cmpf ogt, %44, %186 : vector<2x1xf32>
    %188 = arith.extui %187 : vector<2x1xi1> to vector<2x1xi32>
    %189 = arith.sitofp %188 : vector<2x1xi32> to vector<2x1xf32>
    %190 = vector.broadcast %189 : vector<2x1xf32> to vector<2x32xf32>
    %191 = arith.mulf %190, %183 : vector<2x32xf32>
    %cst_54 = arith.constant 1.000000e+00 : f32
    %192 = vector.broadcast %cst_54 : f32 to vector<2x1xf32>
    %193 = arith.subf %192, %189 : vector<2x1xf32>
    %194 = vector.broadcast %193 : vector<2x1xf32> to vector<2x32xf32>
    %195 = arith.mulf %194, %157 : vector<2x32xf32>
    %196 = arith.addf %191, %195 : vector<2x32xf32>
    %197 = vector.broadcast %189 : vector<2x1xf32> to vector<2x32xf32>
    %198 = arith.mulf %197, %185 : vector<2x32xf32>
    %cst_55 = arith.constant 1.000000e+00 : f32
    %199 = vector.broadcast %cst_55 : f32 to vector<2x1xf32>
    %200 = arith.subf %199, %189 : vector<2x1xf32>
    %201 = vector.broadcast %200 : vector<2x1xf32> to vector<2x32xf32>
    %202 = arith.mulf %201, %164 : vector<2x32xf32>
    %203 = arith.addf %198, %202 : vector<2x32xf32>
    %204 = vector.extract_strided_slice %43 {offsets = [0, 4, 0], sizes = [2, 1, 128], strides = [1, 1, 1]} : vector<2x8x128xf32> to vector<2x1x128xf32>
    %205 = vector.shape_cast %204 : vector<2x1x128xf32> to vector<2x128xf32>
    %206 = arith.truncf %203 : vector<2x32xf32> to vector<2x32xbf16>
    %cst_56 = arith.constant dense<0.000000e+00> : vector<2x128xf32>
    %207 = tpu.matmul %206, %45, %cst_56 {dimension_numbers = #tpu.dot_dimension_numbers<[1], [0], [0], [1], [0, 0, 1, 1], [], []>} : vector<2x32xbf16>, vector<32x128xbf16>, vector<2x128xf32> -> vector<2x128xf32>
    %208 = arith.addf %205, %207 : vector<2x128xf32>
    %209 = vector.extract_strided_slice %208 {offsets = [0, 0], sizes = [2, 96], strides = [1, 1]} : vector<2x128xf32> to vector<2x96xf32>
    %210 = arith.negf %209 : vector<2x96xf32>
    %211 = math.exp %210 : vector<2x96xf32>
    %cst_57 = arith.constant 1.000000e+00 : f32
    %212 = vector.broadcast %cst_57 : f32 to vector<2x96xf32>
    %213 = arith.addf %212, %211 : vector<2x96xf32>
    %214 = arith.divf %212, %213 : vector<2x96xf32>
    %215 = vector.extract_strided_slice %214 {offsets = [0, 0], sizes = [2, 32], strides = [1, 1]} : vector<2x96xf32> to vector<2x32xf32>
    %216 = vector.extract_strided_slice %214 {offsets = [0, 32], sizes = [2, 32], strides = [1, 1]} : vector<2x96xf32> to vector<2x32xf32>
    %217 = vector.extract_strided_slice %214 {offsets = [0, 64], sizes = [2, 32], strides = [1, 1]} : vector<2x96xf32> to vector<2x32xf32>
    %218 = vector.extract_strided_slice %208 {offsets = [0, 96], sizes = [2, 32], strides = [1, 1]} : vector<2x128xf32> to vector<2x32xf32>
    %219 = math.tanh %218 : vector<2x32xf32>
    %220 = arith.mulf %216, %196 : vector<2x32xf32>
    %221 = arith.mulf %215, %219 : vector<2x32xf32>
    %222 = arith.addf %220, %221 : vector<2x32xf32>
    %223 = math.tanh %222 : vector<2x32xf32>
    %224 = arith.mulf %217, %223 : vector<2x32xf32>
    %cst_58 = arith.constant 4.000000e+00 : f32
    %225 = vector.broadcast %cst_58 : f32 to vector<2x1xf32>
    %226 = arith.cmpf ogt, %44, %225 : vector<2x1xf32>
    %227 = arith.extui %226 : vector<2x1xi1> to vector<2x1xi32>
    %228 = arith.sitofp %227 : vector<2x1xi32> to vector<2x1xf32>
    %229 = vector.broadcast %228 : vector<2x1xf32> to vector<2x32xf32>
    %230 = arith.mulf %229, %222 : vector<2x32xf32>
    %cst_59 = arith.constant 1.000000e+00 : f32
    %231 = vector.broadcast %cst_59 : f32 to vector<2x1xf32>
    %232 = arith.subf %231, %228 : vector<2x1xf32>
    %233 = vector.broadcast %232 : vector<2x1xf32> to vector<2x32xf32>
    %234 = arith.mulf %233, %196 : vector<2x32xf32>
    %235 = arith.addf %230, %234 : vector<2x32xf32>
    %236 = vector.broadcast %228 : vector<2x1xf32> to vector<2x32xf32>
    %237 = arith.mulf %236, %224 : vector<2x32xf32>
    %cst_60 = arith.constant 1.000000e+00 : f32
    %238 = vector.broadcast %cst_60 : f32 to vector<2x1xf32>
    %239 = arith.subf %238, %228 : vector<2x1xf32>
    %240 = vector.broadcast %239 : vector<2x1xf32> to vector<2x32xf32>
    %241 = arith.mulf %240, %203 : vector<2x32xf32>
    %242 = arith.addf %237, %241 : vector<2x32xf32>
    %243 = vector.extract_strided_slice %43 {offsets = [0, 5, 0], sizes = [2, 1, 128], strides = [1, 1, 1]} : vector<2x8x128xf32> to vector<2x1x128xf32>
    %244 = vector.shape_cast %243 : vector<2x1x128xf32> to vector<2x128xf32>
    %245 = arith.truncf %242 : vector<2x32xf32> to vector<2x32xbf16>
    %cst_61 = arith.constant dense<0.000000e+00> : vector<2x128xf32>
    %246 = tpu.matmul %245, %45, %cst_61 {dimension_numbers = #tpu.dot_dimension_numbers<[1], [0], [0], [1], [0, 0, 1, 1], [], []>} : vector<2x32xbf16>, vector<32x128xbf16>, vector<2x128xf32> -> vector<2x128xf32>
    %247 = arith.addf %244, %246 : vector<2x128xf32>
    %248 = vector.extract_strided_slice %247 {offsets = [0, 0], sizes = [2, 96], strides = [1, 1]} : vector<2x128xf32> to vector<2x96xf32>
    %249 = arith.negf %248 : vector<2x96xf32>
    %250 = math.exp %249 : vector<2x96xf32>
    %cst_62 = arith.constant 1.000000e+00 : f32
    %251 = vector.broadcast %cst_62 : f32 to vector<2x96xf32>
    %252 = arith.addf %251, %250 : vector<2x96xf32>
    %253 = arith.divf %251, %252 : vector<2x96xf32>
    %254 = vector.extract_strided_slice %253 {offsets = [0, 0], sizes = [2, 32], strides = [1, 1]} : vector<2x96xf32> to vector<2x32xf32>
    %255 = vector.extract_strided_slice %253 {offsets = [0, 32], sizes = [2, 32], strides = [1, 1]} : vector<2x96xf32> to vector<2x32xf32>
    %256 = vector.extract_strided_slice %253 {offsets = [0, 64], sizes = [2, 32], strides = [1, 1]} : vector<2x96xf32> to vector<2x32xf32>
    %257 = vector.extract_strided_slice %247 {offsets = [0, 96], sizes = [2, 32], strides = [1, 1]} : vector<2x128xf32> to vector<2x32xf32>
    %258 = math.tanh %257 : vector<2x32xf32>
    %259 = arith.mulf %255, %235 : vector<2x32xf32>
    %260 = arith.mulf %254, %258 : vector<2x32xf32>
    %261 = arith.addf %259, %260 : vector<2x32xf32>
    %262 = math.tanh %261 : vector<2x32xf32>
    %263 = arith.mulf %256, %262 : vector<2x32xf32>
    %cst_63 = arith.constant 5.000000e+00 : f32
    %264 = vector.broadcast %cst_63 : f32 to vector<2x1xf32>
    %265 = arith.cmpf ogt, %44, %264 : vector<2x1xf32>
    %266 = arith.extui %265 : vector<2x1xi1> to vector<2x1xi32>
    %267 = arith.sitofp %266 : vector<2x1xi32> to vector<2x1xf32>
    %268 = vector.broadcast %267 : vector<2x1xf32> to vector<2x32xf32>
    %269 = arith.mulf %268, %261 : vector<2x32xf32>
    %cst_64 = arith.constant 1.000000e+00 : f32
    %270 = vector.broadcast %cst_64 : f32 to vector<2x1xf32>
    %271 = arith.subf %270, %267 : vector<2x1xf32>
    %272 = vector.broadcast %271 : vector<2x1xf32> to vector<2x32xf32>
    %273 = arith.mulf %272, %235 : vector<2x32xf32>
    %274 = arith.addf %269, %273 : vector<2x32xf32>
    %275 = vector.broadcast %267 : vector<2x1xf32> to vector<2x32xf32>
    %276 = arith.mulf %275, %263 : vector<2x32xf32>
    %cst_65 = arith.constant 1.000000e+00 : f32
    %277 = vector.broadcast %cst_65 : f32 to vector<2x1xf32>
    %278 = arith.subf %277, %267 : vector<2x1xf32>
    %279 = vector.broadcast %278 : vector<2x1xf32> to vector<2x32xf32>
    %280 = arith.mulf %279, %242 : vector<2x32xf32>
    %281 = arith.addf %276, %280 : vector<2x32xf32>
    %282 = vector.extract_strided_slice %43 {offsets = [0, 6, 0], sizes = [2, 1, 128], strides = [1, 1, 1]} : vector<2x8x128xf32> to vector<2x1x128xf32>
    %283 = vector.shape_cast %282 : vector<2x1x128xf32> to vector<2x128xf32>
    %284 = arith.truncf %281 : vector<2x32xf32> to vector<2x32xbf16>
    %cst_66 = arith.constant dense<0.000000e+00> : vector<2x128xf32>
    %285 = tpu.matmul %284, %45, %cst_66 {dimension_numbers = #tpu.dot_dimension_numbers<[1], [0], [0], [1], [0, 0, 1, 1], [], []>} : vector<2x32xbf16>, vector<32x128xbf16>, vector<2x128xf32> -> vector<2x128xf32>
    %286 = arith.addf %283, %285 : vector<2x128xf32>
    %287 = vector.extract_strided_slice %286 {offsets = [0, 0], sizes = [2, 96], strides = [1, 1]} : vector<2x128xf32> to vector<2x96xf32>
    %288 = arith.negf %287 : vector<2x96xf32>
    %289 = math.exp %288 : vector<2x96xf32>
    %cst_67 = arith.constant 1.000000e+00 : f32
    %290 = vector.broadcast %cst_67 : f32 to vector<2x96xf32>
    %291 = arith.addf %290, %289 : vector<2x96xf32>
    %292 = arith.divf %290, %291 : vector<2x96xf32>
    %293 = vector.extract_strided_slice %292 {offsets = [0, 0], sizes = [2, 32], strides = [1, 1]} : vector<2x96xf32> to vector<2x32xf32>
    %294 = vector.extract_strided_slice %292 {offsets = [0, 32], sizes = [2, 32], strides = [1, 1]} : vector<2x96xf32> to vector<2x32xf32>
    %295 = vector.extract_strided_slice %292 {offsets = [0, 64], sizes = [2, 32], strides = [1, 1]} : vector<2x96xf32> to vector<2x32xf32>
    %296 = vector.extract_strided_slice %286 {offsets = [0, 96], sizes = [2, 32], strides = [1, 1]} : vector<2x128xf32> to vector<2x32xf32>
    %297 = math.tanh %296 : vector<2x32xf32>
    %298 = arith.mulf %294, %274 : vector<2x32xf32>
    %299 = arith.mulf %293, %297 : vector<2x32xf32>
    %300 = arith.addf %298, %299 : vector<2x32xf32>
    %301 = math.tanh %300 : vector<2x32xf32>
    %302 = arith.mulf %295, %301 : vector<2x32xf32>
    %cst_68 = arith.constant 6.000000e+00 : f32
    %303 = vector.broadcast %cst_68 : f32 to vector<2x1xf32>
    %304 = arith.cmpf ogt, %44, %303 : vector<2x1xf32>
    %305 = arith.extui %304 : vector<2x1xi1> to vector<2x1xi32>
    %306 = arith.sitofp %305 : vector<2x1xi32> to vector<2x1xf32>
    %307 = vector.broadcast %306 : vector<2x1xf32> to vector<2x32xf32>
    %308 = arith.mulf %307, %300 : vector<2x32xf32>
    %cst_69 = arith.constant 1.000000e+00 : f32
    %309 = vector.broadcast %cst_69 : f32 to vector<2x1xf32>
    %310 = arith.subf %309, %306 : vector<2x1xf32>
    %311 = vector.broadcast %310 : vector<2x1xf32> to vector<2x32xf32>
    %312 = arith.mulf %311, %274 : vector<2x32xf32>
    %313 = arith.addf %308, %312 : vector<2x32xf32>
    %314 = vector.broadcast %306 : vector<2x1xf32> to vector<2x32xf32>
    %315 = arith.mulf %314, %302 : vector<2x32xf32>
    %cst_70 = arith.constant 1.000000e+00 : f32
    %316 = vector.broadcast %cst_70 : f32 to vector<2x1xf32>
    %317 = arith.subf %316, %306 : vector<2x1xf32>
    %318 = vector.broadcast %317 : vector<2x1xf32> to vector<2x32xf32>
    %319 = arith.mulf %318, %281 : vector<2x32xf32>
    %320 = arith.addf %315, %319 : vector<2x32xf32>
    %321 = vector.extract_strided_slice %43 {offsets = [0, 7, 0], sizes = [2, 1, 128], strides = [1, 1, 1]} : vector<2x8x128xf32> to vector<2x1x128xf32>
    %322 = vector.shape_cast %321 : vector<2x1x128xf32> to vector<2x128xf32>
    %323 = arith.truncf %320 : vector<2x32xf32> to vector<2x32xbf16>
    %cst_71 = arith.constant dense<0.000000e+00> : vector<2x128xf32>
    %324 = tpu.matmul %323, %45, %cst_71 {dimension_numbers = #tpu.dot_dimension_numbers<[1], [0], [0], [1], [0, 0, 1, 1], [], []>} : vector<2x32xbf16>, vector<32x128xbf16>, vector<2x128xf32> -> vector<2x128xf32>
    %325 = arith.addf %322, %324 : vector<2x128xf32>
    %326 = vector.extract_strided_slice %325 {offsets = [0, 0], sizes = [2, 96], strides = [1, 1]} : vector<2x128xf32> to vector<2x96xf32>
    %327 = arith.negf %326 : vector<2x96xf32>
    %328 = math.exp %327 : vector<2x96xf32>
    %cst_72 = arith.constant 1.000000e+00 : f32
    %329 = vector.broadcast %cst_72 : f32 to vector<2x96xf32>
    %330 = arith.addf %329, %328 : vector<2x96xf32>
    %331 = arith.divf %329, %330 : vector<2x96xf32>
    %332 = vector.extract_strided_slice %331 {offsets = [0, 0], sizes = [2, 32], strides = [1, 1]} : vector<2x96xf32> to vector<2x32xf32>
    %333 = vector.extract_strided_slice %331 {offsets = [0, 32], sizes = [2, 32], strides = [1, 1]} : vector<2x96xf32> to vector<2x32xf32>
    %334 = vector.extract_strided_slice %331 {offsets = [0, 64], sizes = [2, 32], strides = [1, 1]} : vector<2x96xf32> to vector<2x32xf32>
    %335 = vector.extract_strided_slice %325 {offsets = [0, 96], sizes = [2, 32], strides = [1, 1]} : vector<2x128xf32> to vector<2x32xf32>
    %336 = math.tanh %335 : vector<2x32xf32>
    %337 = arith.mulf %333, %313 : vector<2x32xf32>
    %338 = arith.mulf %332, %336 : vector<2x32xf32>
    %339 = arith.addf %337, %338 : vector<2x32xf32>
    %340 = math.tanh %339 : vector<2x32xf32>
    %341 = arith.mulf %334, %340 : vector<2x32xf32>
    %cst_73 = arith.constant 7.000000e+00 : f32
    %342 = vector.broadcast %cst_73 : f32 to vector<2x1xf32>
    %343 = arith.cmpf ogt, %44, %342 : vector<2x1xf32>
    %344 = arith.extui %343 : vector<2x1xi1> to vector<2x1xi32>
    %345 = arith.sitofp %344 : vector<2x1xi32> to vector<2x1xf32>
    %346 = vector.broadcast %345 : vector<2x1xf32> to vector<2x32xf32>
    %347 = arith.mulf %346, %341 : vector<2x32xf32>
    %cst_74 = arith.constant 1.000000e+00 : f32
    %348 = vector.broadcast %cst_74 : f32 to vector<2x1xf32>
    %349 = arith.subf %348, %345 : vector<2x1xf32>
    %350 = vector.broadcast %349 : vector<2x1xf32> to vector<2x32xf32>
    %351 = arith.mulf %350, %320 : vector<2x32xf32>
    %352 = arith.addf %347, %351 : vector<2x32xf32>
    %353 = arith.truncf %352 : vector<2x32xf32> to vector<2x32xbf16>
    %c0_75 = arith.constant 0 : index
    %c0_76 = arith.constant 0 : index
    %354 = vector.load %arg12[%c0_75, %c0_76] : memref<32x32xbf16, #tpu.memory_space<vmem>>, vector<32x32xbf16>
    %cst_77 = arith.constant dense<0.000000e+00> : vector<2x32xf32>
    %355 = tpu.matmul %353, %354, %cst_77 {dimension_numbers = #tpu.dot_dimension_numbers<[1], [0], [0], [1], [0, 0, 1, 1], [], []>} : vector<2x32xbf16>, vector<32x32xbf16>, vector<2x32xf32> -> vector<2x32xf32>
    %c0_78 = arith.constant 0 : index
    %c0_79 = arith.constant 0 : index
    %356 = vector.load %arg13[%c0_78, %c0_79] : memref<1x32xf32, #tpu.memory_space<vmem>>, vector<1x32xf32>
    %357 = vector.broadcast %356 : vector<1x32xf32> to vector<2x32xf32>
    %358 = arith.addf %355, %357 : vector<2x32xf32>
    %cst_80 = arith.constant 0.000000e+00 : f32
    %359 = vector.broadcast %cst_80 : f32 to vector<2x32xf32>
    %360 = arith.maximumf %358, %359 : vector<2x32xf32>
    %361 = vector.shape_cast %34 : vector<2x8x32xf32> to vector<16x32xf32>
    %362 = arith.truncf %361 : vector<16x32xf32> to vector<16x32xbf16>
    %c0_81 = arith.constant 0 : index
    %c0_82 = arith.constant 0 : index
    %363 = vector.load %arg16[%c0_81, %c0_82] : memref<32x32xbf16, #tpu.memory_space<vmem>>, vector<32x32xbf16>
    %cst_83 = arith.constant dense<0.000000e+00> : vector<16x32xf32>
    %364 = tpu.matmul %362, %363, %cst_83 {dimension_numbers = #tpu.dot_dimension_numbers<[1], [0], [0], [1], [0, 0, 1, 1], [], []>} : vector<16x32xbf16>, vector<32x32xbf16>, vector<16x32xf32> -> vector<16x32xf32>
    %365 = vector.shape_cast %364 : vector<16x32xf32> to vector<2x8x32xf32>
    %c0_84 = arith.constant 0 : index
    %c0_85 = arith.constant 0 : index
    %366 = vector.load %arg3[%c0_84, %c0_85] : memref<2x8xf32, #tpu.memory_space<vmem>>, vector<2x8xf32>
    %cst_86 = arith.constant 5.000000e-01 : f32
    %367 = vector.broadcast %cst_86 : f32 to vector<2x8xf32>
    %368 = arith.cmpf ogt, %366, %367 : vector<2x8xf32>
    %c0_87 = arith.constant 0 : index
    %c0_88 = arith.constant 0 : index
    %369 = vector.load %arg19[%c0_87, %c0_88] : memref<1x32xf32, #tpu.memory_space<vmem>>, vector<1x32xf32>
    %370 = vector.shape_cast %369 : vector<1x32xf32> to vector<1x1x32xf32>
    %c0_89 = arith.constant 0 : index
    %c0_90 = arith.constant 0 : index
    %371 = memref.load %arg20[%c0_89, %c0_90] : memref<1x1xf32, #tpu.memory_space<smem>>
    %372 = arith.truncf %360 : vector<2x32xf32> to vector<2x32xbf16>
    %c0_91 = arith.constant 0 : index
    %c0_92 = arith.constant 0 : index
    %373 = vector.load %arg17[%c0_91, %c0_92] : memref<32x32xbf16, #tpu.memory_space<vmem>>, vector<32x32xbf16>
    %cst_93 = arith.constant dense<0.000000e+00> : vector<2x32xf32>
    %374 = tpu.matmul %372, %373, %cst_93 {dimension_numbers = #tpu.dot_dimension_numbers<[1], [0], [0], [1], [0, 0, 1, 1], [], []>} : vector<2x32xbf16>, vector<32x32xbf16>, vector<2x32xf32> -> vector<2x32xf32>
    %c0_94 = arith.constant 0 : index
    %c0_95 = arith.constant 0 : index
    %375 = vector.load %arg18[%c0_94, %c0_95] : memref<1x32xf32, #tpu.memory_space<vmem>>, vector<1x32xf32>
    %376 = vector.broadcast %375 : vector<1x32xf32> to vector<2x32xf32>
    %377 = arith.addf %374, %376 : vector<2x32xf32>
    %378 = vector.shape_cast %377 : vector<2x32xf32> to vector<2x1x32xf32>
    %379 = vector.broadcast %378 : vector<2x1x32xf32> to vector<2x8x32xf32>
    %380 = arith.addf %365, %379 : vector<2x8x32xf32>
    %381 = math.tanh %380 : vector<2x8x32xf32>
    %382 = vector.broadcast %370 : vector<1x1x32xf32> to vector<2x8x32xf32>
    %383 = arith.mulf %381, %382 : vector<2x8x32xf32>
    %cst_96 = arith.constant dense<0.000000e+00> : vector<2x8xf32>
    %384 = vector.multi_reduction <add>, %383, %cst_96 [2] : vector<2x8x32xf32> to vector<2x8xf32>
    %385 = vector.broadcast %371 : f32 to vector<2x8xf32>
    %386 = arith.addf %384, %385 : vector<2x8xf32>
    %cst_97 = arith.constant -1.000000e+09 : f32
    %387 = vector.broadcast %cst_97 : f32 to vector<2x8xf32>
    %388 = arith.select %368, %387, %386 : vector<2x8xi1>, vector<2x8xf32>
    %cst_98 = arith.constant dense<0xFF800000> : vector<2xf32>
    %389 = vector.multi_reduction <maximumf>, %388, %cst_98 [1] : vector<2x8xf32> to vector<2xf32>
    %cst_99 = arith.constant 0xFF800000 : f32
    %390 = vector.broadcast %cst_99 : f32 to vector<2xf32>
    %391 = arith.maximumf %390, %389 : vector<2xf32>
    %392 = vector.shape_cast %391 : vector<2xf32> to vector<2x1xf32>
    %393 = vector.broadcast %392 : vector<2x1xf32> to vector<2x8xf32>
    %394 = arith.subf %388, %393 : vector<2x8xf32>
    %395 = math.exp %394 : vector<2x8xf32>
    %cst_100 = arith.constant dense<0.000000e+00> : vector<2xf32>
    %396 = vector.multi_reduction <add>, %395, %cst_100 [1] : vector<2x8xf32> to vector<2xf32>
    %397 = vector.shape_cast %396 : vector<2xf32> to vector<2x1xf32>
    %398 = vector.broadcast %397 : vector<2x1xf32> to vector<2x8xf32>
    %399 = arith.divf %395, %398 : vector<2x8xf32>
    %400 = vector.shape_cast %399 : vector<2x8xf32> to vector<2x8x1xf32>
    %401 = vector.broadcast %400 : vector<2x8x1xf32> to vector<2x8x32xf32>
    %402 = arith.mulf %401, %34 : vector<2x8x32xf32>
    %cst_101 = arith.constant dense<0.000000e+00> : vector<2x32xf32>
    %403 = vector.multi_reduction <add>, %402, %cst_101 [1] : vector<2x8x32xf32> to vector<2x32xf32>
    %404 = arith.addf %360, %403 : vector<2x32xf32>
    %405 = arith.truncf %404 : vector<2x32xf32> to vector<2x32xbf16>
    %c0_102 = arith.constant 0 : index
    %c0_103 = arith.constant 0 : index
    %406 = vector.load %arg17[%c0_102, %c0_103] : memref<32x32xbf16, #tpu.memory_space<vmem>>, vector<32x32xbf16>
    %cst_104 = arith.constant dense<0.000000e+00> : vector<2x32xf32>
    %407 = tpu.matmul %405, %406, %cst_104 {dimension_numbers = #tpu.dot_dimension_numbers<[1], [0], [0], [1], [0, 0, 1, 1], [], []>} : vector<2x32xbf16>, vector<32x32xbf16>, vector<2x32xf32> -> vector<2x32xf32>
    %c0_105 = arith.constant 0 : index
    %c0_106 = arith.constant 0 : index
    %408 = vector.load %arg18[%c0_105, %c0_106] : memref<1x32xf32, #tpu.memory_space<vmem>>, vector<1x32xf32>
    %409 = vector.broadcast %408 : vector<1x32xf32> to vector<2x32xf32>
    %410 = arith.addf %407, %409 : vector<2x32xf32>
    %411 = vector.shape_cast %410 : vector<2x32xf32> to vector<2x1x32xf32>
    %412 = vector.broadcast %411 : vector<2x1x32xf32> to vector<2x8x32xf32>
    %413 = arith.addf %365, %412 : vector<2x8x32xf32>
    %414 = math.tanh %413 : vector<2x8x32xf32>
    %415 = vector.broadcast %370 : vector<1x1x32xf32> to vector<2x8x32xf32>
    %416 = arith.mulf %414, %415 : vector<2x8x32xf32>
    %cst_107 = arith.constant dense<0.000000e+00> : vector<2x8xf32>
    %417 = vector.multi_reduction <add>, %416, %cst_107 [2] : vector<2x8x32xf32> to vector<2x8xf32>
    %418 = vector.broadcast %371 : f32 to vector<2x8xf32>
    %419 = arith.addf %417, %418 : vector<2x8xf32>
    %cst_108 = arith.constant -1.000000e+09 : f32
    %420 = vector.broadcast %cst_108 : f32 to vector<2x8xf32>
    %421 = arith.select %368, %420, %419 : vector<2x8xi1>, vector<2x8xf32>
    %cst_109 = arith.constant dense<0xFF800000> : vector<2xf32>
    %422 = vector.multi_reduction <maximumf>, %421, %cst_109 [1] : vector<2x8xf32> to vector<2xf32>
    %cst_110 = arith.constant 0xFF800000 : f32
    %423 = vector.broadcast %cst_110 : f32 to vector<2xf32>
    %424 = arith.maximumf %423, %422 : vector<2xf32>
    %425 = vector.shape_cast %424 : vector<2xf32> to vector<2x1xf32>
    %426 = vector.broadcast %425 : vector<2x1xf32> to vector<2x8xf32>
    %427 = arith.subf %421, %426 : vector<2x8xf32>
    %428 = math.exp %427 : vector<2x8xf32>
    %cst_111 = arith.constant dense<0.000000e+00> : vector<2xf32>
    %429 = vector.multi_reduction <add>, %428, %cst_111 [1] : vector<2x8xf32> to vector<2xf32>
    %430 = vector.shape_cast %429 : vector<2xf32> to vector<2x1xf32>
    %431 = vector.broadcast %430 : vector<2x1xf32> to vector<2x8xf32>
    %432 = arith.divf %428, %431 : vector<2x8xf32>
    %433 = vector.shape_cast %432 : vector<2x8xf32> to vector<2x8x1xf32>
    %434 = vector.broadcast %433 : vector<2x8x1xf32> to vector<2x8x32xf32>
    %435 = arith.mulf %434, %34 : vector<2x8x32xf32>
    %cst_112 = arith.constant dense<0.000000e+00> : vector<2x32xf32>
    %436 = vector.multi_reduction <add>, %435, %cst_112 [1] : vector<2x8x32xf32> to vector<2x32xf32>
    %437 = arith.addf %404, %436 : vector<2x32xf32>
    %438 = vector.shape_cast %432 : vector<2x8xf32> to vector<2x8x1xf32>
    %c0_113 = arith.constant 0 : index
    %c0_114 = arith.constant 0 : index
    %c0_115 = arith.constant 0 : index
    %439 = vector.load %arg4[%c0_113, %c0_114, %c0_115] : memref<2x8x256xbf16, #tpu.memory_space<vmem>>, vector<2x8x256xbf16>
    %440 = arith.extf %439 : vector<2x8x256xbf16> to vector<2x8x256xf32>
    %441 = vector.broadcast %438 : vector<2x8x1xf32> to vector<2x8x256xf32>
    %442 = arith.mulf %441, %440 : vector<2x8x256xf32>
    %cst_116 = arith.constant dense<0.000000e+00> : vector<2x256xf32>
    %443 = vector.multi_reduction <add>, %442, %cst_116 [1] : vector<2x8x256xf32> to vector<2x256xf32>
    %444 = arith.truncf %437 : vector<2x32xf32> to vector<2x32xbf16>
    %c0_117 = arith.constant 0 : index
    %c0_118 = arith.constant 0 : index
    %445 = vector.load %arg21[%c0_117, %c0_118] : memref<32x10xbf16, #tpu.memory_space<vmem>>, vector<32x10xbf16>
    %cst_119 = arith.constant dense<0.000000e+00> : vector<2x10xf32>
    %446 = tpu.matmul %444, %445, %cst_119 {dimension_numbers = #tpu.dot_dimension_numbers<[1], [0], [0], [1], [0, 0, 1, 1], [], []>} : vector<2x32xbf16>, vector<32x10xbf16>, vector<2x10xf32> -> vector<2x10xf32>
    %c0_120 = arith.constant 0 : index
    %c0_121 = arith.constant 0 : index
    %447 = vector.load %arg22[%c0_120, %c0_121] : memref<1x10xf32, #tpu.memory_space<vmem>>, vector<1x10xf32>
    %448 = vector.broadcast %447 : vector<1x10xf32> to vector<2x10xf32>
    %449 = arith.addf %446, %448 : vector<2x10xf32>
    %cst_122 = arith.constant 0.000000e+00 : f32
    %450 = vector.broadcast %cst_122 : f32 to vector<2x118xf32>
    %cst_123 = arith.constant 0.000000e+00 : f32
    %451 = vector.broadcast %cst_123 : f32 to vector<2x120xf32>
    %452 = tpu.concatenate %449, %450, %432, %451, %443 in 1 : vector<2x10xf32>, vector<2x118xf32>, vector<2x8xf32>, vector<2x120xf32>, vector<2x256xf32> -> vector<2x512xf32>
    %c0_124 = arith.constant 0 : index
    %c0_125 = arith.constant 0 : index
    %453 = vector.load %arg23[%c0_124, %c0_125] : memref<2x512xf32, #tpu.memory_space<vmem>>, vector<2x512xf32>
    tpu.vector_store %arg23[%c0_124, %c0_125], %452 {strides = array<i32>} : memref<2x512xf32, #tpu.memory_space<vmem>>, vector<2x512xf32>,
    return
  }
}

</mosaic_0001>

<bundles_post_ra>
// kernel: _lambda_.1
= control target key start
LH: loop header
LB: loop body
LE: loop exit
PB: predicated region body
PF: predicated region fallthrough
CT: control target
= control target key end

     0   :  { %v2822_v20 = vmov 32   ;;  %v2823_v29 = vmov 0.0   ;;  %vm2824_vm0 = vmmov 0   ;;  %vm260_vm1 = vcmask 1043456   ;;  %s2825_s25 = smov 32   ;;  %s3508_s1 = inlined_call_operand.vmem [shape: bf16[2,33,256], index: 1, kind: input, shape index: {}]   ;;  %s3509_s0 = inlined_call_operand.vmem [shape: bf16[2,8,256], index: 0, kind: input, shape index: {}]   ;;  %s3510_s7 = inlined_call_operand.vmem [shape: bf16[64,32], index: 7, kind: input, shape index: {}]   ;;  %s3511_s2 = inlined_call_operand.vmem [shape: bf16[2,8,8], index: 2, kind: input, shape index: {}]   ;;  %s3512_s14 = inlined_call_operand.vmem [shape: bf16[32,32], index: 14, kind: input, shape index: {}]   ;;  %s3513_s10 = inlined_call_operand.vmem [shape: bf16[32,128], index: 10, kind: input, shape index: {}]   ;;  %s3514_s9 = inlined_call_operand.vmem [shape: bf16[16,128], index: 9, kind: input, shape index: {}]   ;;  %s3515_s5 = inlined_call_operand.vmem [shape: bf16[2,8,16], index: 5, kind: input, shape index: {}]   ;;  %s3516_s8 = inlined_call_operand.vmem [shape: f32[1,32], index: 8, kind: input, shape index: {}]   ;;  %s3517_s11 = inlined_call_operand.vmem [shape: f32[1,128], index: 11, kind: input, shape index: {}]   ;;  %s3518_s6 = inlined_call_operand.vmem [shape: f32[2,1], index: 6, kind: input, shape index: {}]   ;;  %s3519_s16 = inlined_call_operand.vmem [shape: bf16[32,32], index: 16, kind: input, shape index: {}]   ;;  %s3520_s15 = inlined_call_operand.vmem [shape: f32[1,32], index: 15, kind: input, shape index: {}]   ;;  %s3521_s12 = inlined_call_operand.vmem [shape: bf16[32,32], index: 12, kind: input, shape index: {}]   ;;  %s3522_s17 = inlined_call_operand.vmem [shape: bf16[32,32], index: 17, kind: input, shape index: {}]   ;;  %s3523_s13 = inlined_call_operand.vmem [shape: f32[1,32], index: 13, kind: input, shape index: {}]   ;;  %s3524_s18 = inlined_call_operand.vmem [shape: f32[1,32], index: 18, kind: input, shape index: {}]   ;;  %s3525_s19 = inlined_call_operand.vmem [shape: f32[1,32], index: 19, kind: input, shape index: {}]   ;;  %s3526_s20 = inlined_call_operand.<no memory space> [shape: f32[1,1], index: 20, kind: input, shape index: {}]   ;;  %s3527_s3 = inlined_call_operand.vmem [shape: f32[2,8], index: 3, kind: input, shape index: {}]   ;;  %s3528_s21 = inlined_call_operand.vmem [shape: bf16[32,10], index: 21, kind: input, shape index: {}]   ;;  %s3529_s4 = inlined_call_operand.vmem [shape: bf16[2,8,256], index: 4, kind: input, shape index: {}]   ;;  %s3530_s22 = inlined_call_operand.vmem [shape: f32[1,10], index: 22, kind: input, shape index: {}]   ;;  %s3531_s23 = inlined_call_operand.vmem [shape: f32[2,512], index: 23, kind: output, shape index: {}]  }
   0x1   :  { %3538 = sst [smem:[#allocation3_spill]] %s3508_s1  ;;  %2627 = vset.pattern.permute.xlu0 %v2822_v20  ;;  %vm256_vm2 = vcmask 64512   ;;  %vm358_vm3 = vcmask 261120   ;;  %vm400_vm4 = vcmask 523264   ;;  %vm543_vm5 = vcmask 130048  }
   0x2   :  { %3539 = sst [smem:[#allocation4_spill]] %s3509_s0  ;;  %vm722_vm6 = vcmask 1041409  }
   0x3   :  { %3540 = sst [smem:[#allocation5_spill]] %s3510_s7 }
   0x4   :  { %3541 = sst [smem:[#allocation6_spill]] %s3511_s2 }
   0x5   :  { %3542 = sst [smem:[#allocation7_spill]] %s3512_s14 }
   0x6   :  { %3543 = sst [smem:[#allocation8_spill]] %s3513_s10  ;;  %s2827_s10 = smov 64  }
   0x7   :  { %3544 = sst [smem:[#allocation9_spill]] %s3514_s9 }
   0x8   :  { %3545 = sst [smem:[#allocation10_spill]] %s3515_s5 }
   0x9   :  { %s3546_s24 = sld [smem:[#allocation3_spill]] }
   0xa   :  { %s3547_s28 = sld [smem:[#allocation4_spill]] }
   0xb   :  { %s3548_s2 = sld [smem:[#allocation6_spill]] }
   0xc   :  { %s3549_s30 = sld [smem:[#allocation5_spill]] }
   0xd   :  { %s3551_s0 = sld [smem:[#allocation8_spill]] }
   0xf   :  { %v82_v0 = vld [vmem:[%s3546_s24 + $0x20] sm:$0x11]  ;;  %v87_v1 = vld [vmem:[%s3546_s24 + $0x48] sm:$0x11]  ;;  %v2639_v6 = vld [vmem:[%s3546_s24 + $0x14] ss:$8 sps:$4 sm:$0xff]  }
  0x10   :  { %v2346_v2 = vcombine.high %v82_v0, %v82_v0  ;;  %v2354_v3 = vcombine.high %v87_v1, %v87_v1  ;;  %v2345_v4 = vcombine.low %v82_v0, %v82_v0  ;;  %v2353_v5 = vcombine.low %v87_v1, %v87_v1  ;;  %v2641_v7 = vld [vmem:[%s3546_s24 + $0x3c] ss:$8 sps:$4 sm:$0xff]   ;;  %v77_v9 = vld [vmem:[%s3547_s28 + $0x8] sm:$0xff]  ;;  %v2643_v12 = vld [vmem:[%s3546_s24 + $0x10] ss:$8 sps:$4 sm:$0xff]  }
  0x11   :  { %v76_v8 = vld [vmem:[%s3547_s28] sm:$0xff]  ;;  %v2348_v11 = vcombine.high %v77_v9, %v77_v9  ;;  %v2647_v15 = vld [vmem:[%s3546_s24 + $0x2c] ss:$8 sps:$4 sm:$0xff]   ;;  %v2650_v17 = vld [vmem:[%s3546_s24 + $0x28] ss:$8 sps:$4 sm:$0xff]   ;;  %v2347_v19 = vcombine.low %v77_v9, %v77_v9 }
  0x12   :  { %132 = vmatprep.subr.bf16.mxu0 %v2346_v2  ;;  %206 = vmatprep.subr.bf16.mxu1 %v2354_v3  ;;  %v2340_v10 = vcombine.high %v76_v8, %v76_v8  ;;  %v2644_v13 = vld [vmem:[%s3546_s24 + $0x38] ss:$8 sps:$4 sm:$0xff]   ;;  %v2645_v14 = vld [vmem:[%s3546_s24 + $0x4] ss:$8 sps:$4 sm:$0xff]   ;;  %v2339_v18 = vcombine.low %v76_v8, %v76_v8  ;;  %v2656_v46 = vld [vmem:[%s3549_s30 + $0x10] sm:$0xff]   ;;  %v2826_v3 = vmov 0  }
  0x13   :  { %133 = vmatpush1.bf16.xpose.msra.mxu0 %v2345_v4  ;;  %207 = vmatpush1.bf16.xpose.msra.mxu1 %v2353_v5  ;;  %v2649_v16 = vld [vmem:[%s3546_s24] ss:$8 sps:$4 sm:$0xff]   ;;  %v2655_v41 = vld [vmem:[%s3549_s30 + $0x18] sm:$0xff]   ;;  %v253_v45 = vld [vmem:[%s3548_s2 + $0x4] sm:$0xf]  ;;  %s3552_s24 = sld [smem:[#allocation9_spill]] }
  0x14   :  { %134 = vmatprep.subr.bf16.mxu0 %v2639_v6  ;;  %208 = vmatprep.subr.bf16.mxu1 %v2641_v7  ;;  %v252_v40 = vld [vmem:[%s3548_s2] sm:$0xf]  ;;  %v2657_v47 = vld [vmem:[%s3549_s30 + $0x8] sm:$0xff]   ;;  %s3550_s2 = sld [smem:[#allocation7_spill]] }
  0x15   :  { %154 = vmatprep.mubr.bf16.mxu0 %v2340_v10  ;;  %228 = vmatprep.mubr.bf16.mxu1 %v2348_v11  ;;  %v2658_v48 = vld [vmem:[%s3549_s30] sm:$0xff]   ;;  %v3040_v1 = vld [vmem:[%s3551_s0 + $0x8] sm:$0xff]  }
  0x16   :  { %v3048_v2 = vld [vmem:[%s3551_s0] sm:$0xff]   ;;  %2633 = vset.pattern.permute.xlu1 %v2826_v3  ;;  %s2828_s0 = smov 96  }
  0x17   :  { %v2363_v5 = vld [vmem:[%s3516_s8] ss:$0 sm:$0xff] }
  0x1a   :  { %v2659_v63 = vld [vmem:[%s3550_s2 + $0x8] sm:$0xff]   ;;  %v2660_v0 = vld [vmem:[%s3550_s2] sm:$0xff]   ;;  %s3553_s2 = sld [smem:[#allocation10_spill]] }
  0x1b   :  { %135 = vmatpush1.bf16.xpose.msra.mxu0 %v2643_v12  ;;  %209 = vmatpush1.bf16.xpose.msra.mxu1 %v2644_v13  ;;  %v2662_v13 = vld [vmem:[%s3552_s24] sm:$0xff]  }
  0x1c   :  { %136 = vmatprep.subr.bf16.mxu0 %v2645_v14  ;;  %210 = vmatprep.subr.bf16.mxu1 %v2647_v15 }
  0x20   :  { %v2664_v15 = vld [vmem:[%s3553_s2] sm:$0xff]  }
  0x23   :  { %137 = vmatpush1.bf16.xpose.msra.mxu0 %v2649_v16  ;;  %211 = vmatpush1.bf16.xpose.msra.mxu1 %v2650_v17 }
  0x24   :  { %2476 = vmatprep.subr.bf16.mxu0 %v2823_v29  ;;  %2482 = vmatprep.subr.bf16.mxu1 %v2823_v29 }
  0x2a   :  { %155 = vmatmul.mubr.bf16.vlgmr.msra.gmra.mxu0 %v2339_v18  ;;  %229 = vmatmul.mubr.bf16.vlgmr.msra.gmra.mxu1 %v2347_v19 }
  0x2b   :  { %2478 = vmatprep.mubr.msk.bf16.mxu0 %vm2824_vm0, %v2823_v29  ;;  %2484 = vmatprep.mubr.msk.bf16.mxu1 %vm2824_vm0, %v2823_v29 }
  0xea   :  { %v156_v21 = vpop.f32.mrf.mxu0  ;;  %v230_v22 = vpop.f32.mrf.mxu1 }
  0xeb   :  { %v236_v23 = vmax.f32 %v156_v21, 1.0  ;;  %v237_v26 = vmax.f32 %v230_v22, 1.0 }
  0xec   :  { %v158_v24 = vpop.f32.mrf.mxu0  ;;  %v232_v25 = vpop.f32.mrf.mxu1 }
  0xed   :  { %240 = vperm.xlu0 %2627, %v236_v23   ;;  %v2371_v24 = vld [vmem:[%s3517_s11] ss:$0 sm:$0xff] }
  0xee   :  { %v159_v27 = vpop.f32.mrf.mxu0  ;;  %v233_v28 = vpop.f32.mrf.mxu1 }
  0xf0   :  { %v160_v30 = vpop.f32.mrf.mxu0  ;;  %v234_v31 = vpop.f32.mrf.mxu1 }
  0xf1   :  { %245 = vperm.xlu0 %2627, %v237_v26  }
  0xf5   :  { %2634 = vset.pattern.permute.xlu0 %v2826_v3 }
 0x168   :  { %v241_v32 = vpop.permute.xlu0 %240 }
 0x169   :  { %2673 = vrcp.f32 %v241_v32 }
 0x16c   :  { %v246_v33 = vpop.permute.xlu0 %245 }
 0x16d   :  { %2675 = vrcp.f32 %v246_v33 }
 0x176   :  { %v2674_v34 = vpop.eup %2673 }
 0x177   :  { %v249_v35 = vmul.f32 %v2674_v34, %v156_v21 }
 0x179   :  { %v254_v36 = vpack.c.bf16 %v249_v35, %v249_v35 }
 0x17a   :  { %v2676_v37 = vpop.eup %2675 }
 0x17b   :  { %v262_v38 = vsel %vm260_vm1, %v254_v36, 0  ;;  %v251_v39 = vmul.f32 %v2676_v37, %v230_v22 }
 0x17c   :  { %2477 = vmatpush3.bf16.msra.mxu0 %v262_v38 }
 0x17d   :  { %v2628_v42 = vpack.i.bf16 %v251_v39, %v249_v35  ;;  %v255_v43 = vpack.c.bf16 %v251_v39, %v251_v39  ;;  %2488 = vmatprep.subr.bf16.mxu0 %v2823_v29 }
 0x17f   :  { %2479 = vmatmul.mubr.msk.bf16.vlgmr.msra.gmra.mxu0 %vm256_vm2, %v252_v40  ;;  %2629 = vrot.lane.b32.xlu1 %v2628_v42, %s2825_s25  ;;  %v308_v44 = vsel %vm260_vm1, %v255_v43, 0  ;;  %vm2311_vm1 = vcmask 80896  }
 0x180   :  { %2483 = vmatpush3.bf16.msra.mxu1 %v308_v44  ;;  %2489 = vmatpush3.bf16.msra.mxu0 %v2655_v41 }
 0x181   :  { %2490 = vmatprep.subr.bf16.mxu0 %v2823_v29  ;;  %2496 = vmatprep.mubr.msk.bf16.mxu0 %vm2824_vm0, %v2823_v29 }
 0x182   :  { %2500 = vmatprep.subr.bf16.mxu1 %v2823_v29 }
 0x183   :  { %2485 = vmatmul.mubr.msk.bf16.vlgmr.msra.gmra.mxu1 %vm256_vm2, %v253_v45 }
 0x184   :  { %2491 = vmatpush3.bf16.msra.mxu0 %v2656_v46  ;;  %2504 = vmatprep.mubr.msk.bf16.mxu1 %vm2824_vm0, %v2823_v29 }
 0x185   :  { %2492 = vmatprep.subr.bf16.mxu0 %v2823_v29  ;;  %2501 = vmatpush3.bf16.msra.mxu1 %v2659_v63 }
 0x186   :  { %2502 = vmatprep.subr.bf16.mxu1 %v2823_v29 }
 0x188   :  { %2493 = vmatpush3.bf16.msra.mxu0 %v2657_v47 }
 0x189   :  { %2494 = vmatprep.subr.bf16.mxu0 %v2823_v29  ;;  %2503 = vmatpush3.bf16.msra.mxu1 %v2660_v0 }
 0x18a   :  { %2508 = vmatprep.subr.bf16.mxu1 %v2823_v29 }
 0x18c   :  { %2495 = vmatpush3.bf16.msra.mxu0 %v2658_v48 }
 0x18d   :  { %2514 = vmatprep.subr.bf16.mxu0 %v2823_v29 }
 0x1f1   :  { %v2630_v49 = vpop.permute.xlu1 %2629 }
 0x1f2   :  { %v2632_v52 = vunpack.i.h.bf16 %v2630_v49  ;;  %v2631_v53 = vunpack.i.l.bf16 %v2630_v49 }
 0x23f   :  { %v298_v50 = vpop.f32.mrf.mxu0 }
 0x240   :  { %v359_v56 = vsel %vm358_vm3, %v298_v50, %v2631_v53 }
 0x241   :  { %v2480_v51 = vpop.f32.mrf.mxu0 }
 0x243   :  { %v344_v54 = vpop.f32.mrf.mxu1  ;;  %v301_v55 = vpop.f32.mrf.mxu0 }
 0x244   :  { %v360_v57 = vsel %vm358_vm3, %v344_v54, %v2632_v52 }
 0x245   :  { %v2422_v58 = vpack.c.bf16 %v360_v57, %v359_v56  ;;  %v2486_v59 = vpop.f32.mrf.mxu1  ;;  %v2481_v60 = vpop.f32.mrf.mxu0  ;;  %v3098_v57 = vld [vmem:[%s3518_s6] sm:$0x3] }
 0x246   :  { %vm711_vm7 = vcmp.gt.f32.partialorder %v3098_v57, 0.0  ;;  %vm851_vm8 = vcmp.gt.f32.partialorder %v3098_v57, 1.0  ;;  %vm993_vm9 = vcmp.gt.f32.partialorder %v3098_v57, 2.0  ;;  %vm1137_vm10 = vcmp.gt.f32.partialorder %v3098_v57, 3.0 }
 0x247   :  { %v347_v61 = vpop.f32.mrf.mxu1  ;;  %2497 = vmatmul.mubr.msk.bf16.vlgmr.msra.gmra.mxu0 %vm400_vm4, %v2422_v58  ;;  %v2376_v59 = vsel %vm711_vm7, 1.0, %v2823_v29  ;;  %vm1281_vm11 = vcmp.gt.f32.partialorder %v3098_v57, 4.0  ;;  %vm1425_vm12 = vcmp.gt.f32.partialorder %v3098_v57, 5.0  ;;  %vm1569_vm13 = vcmp.gt.f32.partialorder %v3098_v57, 6.0 }
 0x248   :  { %2518 = vmatprep.mubr.msk.bf16.mxu0 %vm2824_vm0, %v2823_v29  ;;  %2515 = vmatpush3.bf16.msra.mxu0 %v3040_v1  ;;  %v728_v60 = vsub.f32 1.0, %v2376_v59 }
 0x249   :  { %v2487_v62 = vpop.f32.mrf.mxu1  ;;  %2516 = vmatprep.subr.bf16.mxu0 %v2823_v29 }
 0x24c   :  { %2517 = vmatpush3.bf16.msra.mxu0 %v3048_v2 }
 0x24d   :  { %2530 = vmatprep.subr.bf16.mxu0 %v2823_v29 }
 0x24f   :  { %2519 = vmatmul.mubr.bf16.vlgmr.msra.gmra.mxu0 %v2826_v3 }
 0x250   :  { %2531 = vmatpush3.bf16.msra.mxu0 %v3040_v1  ;;  %2534 = vmatprep.mubr.msk.bf16.mxu0 %vm2824_vm0, %v2823_v29 }
 0x251   :  { %2532 = vmatprep.subr.bf16.mxu0 %v2823_v29 }
 0x254   :  { %2533 = vmatpush3.bf16.msra.mxu0 %v3048_v2 }
 0x255   :  { %2546 = vmatprep.subr.bf16.mxu0 %v2823_v29 }
 0x307   :  { %v438_v4 = vpop.f32.mrf.mxu0 }
 0x308   :  { %v452_v7 = vadd.f32 %v2363_v5, %v438_v4 }
 0x309   :  { %v2498_v6 = vpop.f32.mrf.mxu0 }
 0x30a   :  { %v454_v11 = vmax.f32 %v452_v7, 0.0 }
 0x30b   :  { %v441_v8 = vpop.f32.mrf.mxu0 }
 0x30c   :  { %v453_v9 = vadd.f32 %v2363_v5, %v441_v8 }
 0x30d   :  { %v2499_v10 = vpop.f32.mrf.mxu0 }
 0x30e   :  { %v455_v12 = vmax.f32 %v453_v9, 0.0 }
 0x30f   :  { %v651_v16 = vpop.f32.mrf.mxu0 }
 0x310   :  { %v456_v14 = vpack.c.bf16 %v455_v12, %v454_v11  ;;  %v658_v28 = vrot.slane %v651_v16, 1 }
 0x311   :  { %v2520_v17 = vpop.f32.mrf.mxu0 }
 0x312   :  { %2505 = vmatmul.mubr.msk.bf16.vlgmr.msra.gmra.mxu1 %vm358_vm3, %v456_v14 }
 0x313   :  { %2509 = vmatpush3.bf16.msra.mxu1 %v2662_v13  ;;  %2510 = vmatprep.mubr.msk.bf16.mxu1 %vm2824_vm0, %v2823_v29  ;;  %v654_v18 = vpop.f32.mrf.mxu0 }
 0x314   :  { %2522 = vmatprep.subr.bf16.mxu1 %v2823_v29 }
 0x315   :  { %v2521_v19 = vpop.f32.mrf.mxu0 }
 0x31a   :  { %2511 = vmatmul.mubr.msk.bf16.vlgmr.msra.gmra.mxu1 %vm543_vm5, %v2664_v15 }
 0x31b   :  { %2523 = vmatpush3.bf16.msra.mxu1 %v3040_v1  ;;  %2526 = vmatprep.mubr.msk.bf16.mxu1 %vm2824_vm0, %v2823_v29 }
 0x31c   :  { %2524 = vmatprep.subr.bf16.mxu1 %v2823_v29 }
 0x31f   :  { %2525 = vmatpush3.bf16.msra.mxu1 %v3048_v2 }
 0x320   :  { %2538 = vmatprep.subr.bf16.mxu1 %v2823_v29 }
 0x3d2   :  { %v3077_v20 = vpop.f32.mrf.mxu1 }
 0x3d4   :  { %v2506_v21 = vpop.f32.mrf.mxu1 }
 0x3d6   :  { %v3079_v22 = vpop.f32.mrf.mxu1 }
 0x3d8   :  { %v2507_v23 = vpop.f32.mrf.mxu1 }
 0x3da   :  { %v581_v25 = vpop.f32.mrf.mxu1 }
 0x3db   :  { %v3084_v26 = vadd.f32 %v2371_v24, %v581_v25 }
 0x3dc   :  { %v2512_v27 = vpop.f32.mrf.mxu1 }
 0x3dd   :  { %v661_v30 = vadd.f32 %v651_v16, %v3084_v26 }
 0x3de   :  { %v584_v31 = vpop.f32.mrf.mxu1 }
 0x3df   :  { %2677 = vtanh.f32 %v661_v30  ;;  %v3087_v32 = vadd.f32 %v2371_v24, %v584_v31  ;;  %v2374_v37 = vmul.f32 -1.442695, %v661_v30 }
 0x3e0   :  { %v2513_v33 = vpop.f32.mrf.mxu1 }
 0x3e1   :  { %v662_v34 = vadd.f32 %v658_v28, %v3087_v32 }
 0x3e3   :  { %2679 = vtanh.f32 %v662_v34  ;;  %v2375_v38 = vmul.f32 -1.442695, %v662_v34 }
 0x3e4   :  { %2681 = vpow2.f32 %v2374_v37 }
 0x3e5   :  { %2683 = vpow2.f32 %v2375_v38 }
 0x3ec   :  { %v2678_v35 = vpop.eup %2677 }
 0x3ed   :  { %681 = vrot.lane.b32.xlu0 %v2678_v35, %s2825_s25 }
 0x3f0   :  { %v2680_v36 = vpop.eup %2679 }
 0x3f1   :  { %683 = vrot.lane.b32.xlu1 %v2680_v36, %s2825_s25  ;;  %v2682_v39 = vpop.eup %2681 }
 0x3f2   :  { %v669_v40 = vadd.f32 1.0, %v2682_v39  ;;  %v2684_v41 = vpop.eup %2683 }
 0x3f3   :  { %v670_v42 = vadd.f32 1.0, %v2684_v41 }
 0x3f4   :  { %2685 = vrcp.f32 %v669_v40 }
 0x3f5   :  { %2687 = vrcp.f32 %v670_v42 }
 0x401   :  { %v2686_v43 = vpop.eup %2685 }
 0x402   :  { %v2688_v46 = vpop.eup %2687  ;;  %v677_v49 = vmul.f32 0.0, %v2686_v43 }
 0x403   :  { %v678_v52 = vmul.f32 0.0, %v2688_v46 }
 0x45f   :  { %v682_v44 = vpop.permute.xlu0 %681 }
 0x460   :  { %v687_v45 = vmul.f32 %v2686_v43, %v682_v44 }
 0x462   :  { %691 = vrot.lane.b32.xlu0 %v687_v45, %s2825_s25 }
 0x463   :  { %v684_v47 = vpop.permute.xlu1 %683 }
 0x464   :  { %v688_v48 = vmul.f32 %v2688_v46, %v684_v47 }
 0x466   :  { %693 = vrot.lane.b32.xlu1 %v688_v48, %s2825_s25 }
 0x4d4   :  { %v692_v50 = vpop.permute.xlu0 %691 }
 0x4d5   :  { %v697_v51 = vadd.f32 %v692_v50, %v677_v49 }
 0x4d7   :  { %2689 = vtanh.f32 %v697_v51 }
 0x4d8   :  { %v694_v53 = vpop.permute.xlu1 %693 }
 0x4d9   :  { %v698_v54 = vadd.f32 %v694_v53, %v678_v52 }
 0x4db   :  { %2691 = vtanh.f32 %v698_v54  ;;  %v721_v55 = vrot.slane %v698_v54, 7 }
 0x4dd   :  { %v723_v56 = vsel %vm722_vm6, %v721_v55, %v697_v51  ;;  %v2380_v51 = vsel %vm851_vm8, 1.0, %v2823_v29 }
 0x4de   :  { %v867_v53 = vsub.f32 1.0, %v2380_v51 }
 0x4e4   :  { %v2690_v58 = vpop.eup %2689 }
 0x4e5   :  { %703 = vrot.lane.b32.xlu0 %v2690_v58, %s2825_s25 }
 0x4e8   :  { %v2692_v61 = vpop.eup %2691 }
 0x4e9   :  { %705 = vrot.lane.b32.xlu1 %v2692_v61, %s2825_s25  ;;  %731 = vperm.xlu0 %2634, %v728_v60  }
 0x4ed   :  { %716 = vperm.xlu1 %2633, %v2376_v59  }
 0x557   :  { %v704_v62 = vpop.permute.xlu0 %703 }
 0x558   :  { %v709_v3 = vmul.f32 %v2686_v43, %v704_v62 }
 0x55b   :  { %v706_v63 = vpop.permute.xlu1 %705 }
 0x55c   :  { %v710_v0 = vmul.f32 %v2688_v46, %v706_v63 }
 0x55e   :  { %v738_v4 = vrot.slane %v710_v0, 7 }
 0x560   :  { %v739_v5 = vsel %vm722_vm6, %v738_v4, %v709_v3 }
 0x561   :  { %740 = vrot.lane.b32.xlu1 %v739_v5, %s2827_s10 }
 0x564   :  { %v732_v7 = vpop.permute.xlu0 %731 }
 0x565   :  { %724 = vrot.lane.b32.xlu1 %v723_v56, %s2828_s0  ;;  %v734_v8 = vmul.f32 0.0, %v732_v7 }
 0x568   :  { %v717_v6 = vpop.permute.xlu1 %716 }
 0x5d3   :  { %v741_v9 = vpop.permute.xlu1 %740 }
 0x5d4   :  { %v743_v10 = vmul.f32 %v741_v9, %v717_v6 }
 0x5d6   :  { %v3107_v11 = vadd.f32 %v743_v10, %v734_v8 }
 0x5d7   :  { %v725_v21 = vpop.permute.xlu1 %724 }
 0x5d8   :  { %v745_v12 = vpack.c.bf16 %v3107_v11, %v3107_v11  ;;  %v727_v23 = vmul.f32 %v725_v21, %v717_v6 }
 0x5da   :  { %2527 = vmatmul.mubr.msk.bf16.vlgmr.msra.gmra.mxu1 %vm358_vm3, %v745_v12  ;;  %v3121_v25 = vadd.f32 %v734_v8, %v727_v23 }
 0x5db   :  { %2539 = vmatpush3.bf16.msra.mxu1 %v3040_v1  ;;  %2542 = vmatprep.mubr.msk.bf16.mxu1 %vm2824_vm0, %v2823_v29 }
 0x5dc   :  { %2540 = vmatprep.subr.bf16.mxu1 %v2823_v29  ;;  %v810_v28 = vrot.slane %v3121_v25, 7 }
 0x5df   :  { %2541 = vmatpush3.bf16.msra.mxu1 %v3048_v2 }
 0x5e0   :  { %2554 = vmatprep.subr.bf16.mxu1 %v2823_v29 }
 0x69a   :  { %v783_v13 = vpop.f32.mrf.mxu1 }
 0x69b   :  { %v790_v14 = vrot.slane %v783_v13, 7  ;;  %v794_v15 = vadd.f32 %v783_v13, %v3087_v32 }
 0x69c   :  { %v2528_v16 = vpop.f32.mrf.mxu1 }
 0x69d   :  { %v793_v17 = vadd.f32 %v790_v14, %v3084_v26  ;;  %2693 = vtanh.f32 %v794_v15  ;;  %v2379_v30 = vmul.f32 -1.442695, %v794_v15 }
 0x69e   :  { %v786_v18 = vpop.f32.mrf.mxu1 }
 0x69f   :  { %2695 = vtanh.f32 %v793_v17  ;;  %v2378_v31 = vmul.f32 -1.442695, %v793_v17 }
 0x6a0   :  { %v2529_v19 = vpop.f32.mrf.mxu1  ;;  %2697 = vpow2.f32 %v2379_v30 }
 0x6a1   :  { %2699 = vpow2.f32 %v2378_v31 }
 0x6aa   :  { %v2694_v24 = vpop.eup %2693 }
 0x6ab   :  { %823 = vrot.lane.b32.xlu1 %v2694_v24, %s2825_s25 }
 0x6ac   :  { %v2696_v27 = vpop.eup %2695 }
 0x6ad   :  { %821 = vrot.lane.b32.xlu0 %v2696_v27, %s2825_s25  ;;  %v2698_v33 = vpop.eup %2697 }
 0x6ae   :  { %v2700_v34 = vpop.eup %2699  ;;  %v802_v35 = vadd.f32 1.0, %v2698_v33 }
 0x6af   :  { %813 = vrot.lane.b32.xlu1 %v3121_v25, %s2825_s25  ;;  %v801_v36 = vadd.f32 1.0, %v2700_v34 }
 0x6b0   :  { %2701 = vrcp.f32 %v802_v35 }
 0x6b1   :  { %811 = vrot.lane.b32.xlu0 %v810_v28, %s2825_s25  ;;  %2703 = vrcp.f32 %v801_v36 }
 0x6bd   :  { %v2702_v37 = vpop.eup %2701 }
 0x6be   :  { %v2704_v40 = vpop.eup %2703 }
 0x71d   :  { %v824_v38 = vpop.permute.xlu1 %823 }
 0x71e   :  { %v828_v39 = vmul.f32 %v2702_v37, %v824_v38 }
 0x71f   :  { %v822_v41 = vpop.permute.xlu0 %821 }
 0x720   :  { %833 = vrot.lane.b32.xlu1 %v828_v39, %s2825_s25  ;;  %v827_v42 = vmul.f32 %v2704_v40, %v822_v41 }
 0x721   :  { %v814_v43 = vpop.permute.xlu1 %813 }
 0x722   :  { %831 = vrot.lane.b32.xlu0 %v827_v42, %s2825_s25  ;;  %v818_v44 = vmul.f32 %v2702_v37, %v814_v43 }
 0x723   :  { %v812_v45 = vpop.permute.xlu0 %811 }
 0x724   :  { %v817_v48 = vmul.f32 %v2704_v40, %v812_v45 }
 0x792   :  { %v834_v46 = vpop.permute.xlu1 %833 }
 0x793   :  { %v838_v47 = vadd.f32 %v834_v46, %v818_v44 }
 0x794   :  { %v832_v49 = vpop.permute.xlu0 %831 }
 0x795   :  { %2705 = vtanh.f32 %v838_v47  ;;  %v837_v50 = vadd.f32 %v832_v49, %v817_v48 }
 0x797   :  { %2707 = vtanh.f32 %v837_v50  ;;  %v861_v55 = vrot.slane %v837_v50, 1  ;;  %v2384_v50 = vsel %vm993_vm9, 1.0, %v2823_v29 }
 0x799   :  { %v862_v56 = vsel %vm722_vm6, %v838_v47, %v861_v55 }
 0x7a2   :  { %v2706_v52 = vpop.eup %2705 }
 0x7a3   :  { %845 = vrot.lane.b32.xlu1 %v2706_v52, %s2825_s25 }
 0x7a4   :  { %v2708_v54 = vpop.eup %2707 }
 0x7a5   :  { %843 = vrot.lane.b32.xlu0 %v2708_v54, %s2825_s25 }
 0x7a7   :  { %870 = vperm.xlu1 %2633, %v867_v53   ;;  %v1010_v53 = vsub.f32 1.0, %v2384_v50 }
 0x7a9   :  { %856 = vperm.xlu0 %2634, %v2380_v51  }
 0x7ab   :  { %863 = vrot.lane.b32.xlu1 %v862_v56, %s2828_s0 }
 0x815   :  { %v846_v58 = vpop.permute.xlu1 %845 }
 0x816   :  { %v850_v61 = vmul.f32 %v2702_v37, %v846_v58 }
 0x817   :  { %v844_v59 = vpop.permute.xlu0 %843 }
 0x818   :  { %v849_v60 = vmul.f32 %v2704_v40, %v844_v59 }
 0x81a   :  { %v877_v62 = vrot.slane %v849_v60, 1 }
 0x81c   :  { %v878_v63 = vsel %vm722_vm6, %v850_v61, %v877_v62 }
 0x81d   :  { %879 = vrot.lane.b32.xlu0 %v878_v63, %s2827_s10 }
 0x822   :  { %v871_v3 = vpop.permute.xlu1 %870 }
 0x823   :  { %v883_v5 = vmul.f32 %v871_v3, %v3107_v11  ;;  %v873_v19 = vmul.f32 %v871_v3, %v3121_v25 }
 0x824   :  { %v857_v0 = vpop.permute.xlu0 %856 }
 0x826   :  { %v864_v17 = vpop.permute.xlu1 %863 }
 0x827   :  { %v866_v18 = vmul.f32 %v864_v17, %v857_v0 }
 0x829   :  { %v3153_v21 = vadd.f32 %v873_v19, %v866_v18 }
 0x82b   :  { %v951_v27 = vrot.slane %v3153_v21, 6  ;;  %v952_v28 = vrot.slane %v3153_v21, 7 }
 0x88f   :  { %v880_v4 = vpop.permute.xlu0 %879 }
 0x890   :  { %v882_v6 = vmul.f32 %v880_v4, %v857_v0 }
 0x892   :  { %v3139_v7 = vadd.f32 %v883_v5, %v882_v6 }
 0x894   :  { %v885_v8 = vpack.c.bf16 %v3139_v7, %v3139_v7 }
 0x896   :  { %2535 = vmatmul.mubr.msk.bf16.vlgmr.msra.gmra.mxu0 %vm358_vm3, %v885_v8 }
 0x897   :  { %2547 = vmatpush3.bf16.msra.mxu0 %v3040_v1  ;;  %2550 = vmatprep.mubr.msk.bf16.mxu0 %vm2824_vm0, %v2823_v29 }
 0x898   :  { %2548 = vmatprep.subr.bf16.mxu0 %v2823_v29 }
 0x89b   :  { %2549 = vmatpush3.bf16.msra.mxu0 %v3048_v2 }
 0x89c   :  { %2562 = vmatprep.subr.bf16.mxu0 %v2823_v29 }
 0x956   :  { %v923_v9 = vpop.f32.mrf.mxu0 }
 0x957   :  { %v930_v10 = vrot.slane %v923_v9, 6  ;;  %v931_v11 = vrot.slane %v923_v9, 7 }
 0x958   :  { %v2536_v12 = vpop.f32.mrf.mxu0 }
 0x959   :  { %v934_v13 = vadd.f32 %v930_v10, %v3084_v26  ;;  %v935_v14 = vadd.f32 %v931_v11, %v3087_v32 }
 0x95a   :  { %v926_v15 = vpop.f32.mrf.mxu0 }
 0x95b   :  { %2709 = vtanh.f32 %v934_v13  ;;  %v2382_v30 = vmul.f32 -1.442695, %v934_v13  ;;  %v2383_v31 = vmul.f32 -1.442695, %v935_v14 }
 0x95c   :  { %2711 = vtanh.f32 %v935_v14  ;;  %v2537_v16 = vpop.f32.mrf.mxu0 }
 0x95d   :  { %2713 = vpow2.f32 %v2382_v30 }
 0x95e   :  { %2715 = vpow2.f32 %v2383_v31 }
 0x968   :  { %v2710_v23 = vpop.eup %2709 }
 0x969   :  { %v2712_v24 = vpop.eup %2711  ;;  %963 = vrot.lane.b32.xlu0 %v2710_v23, %s2825_s25 }
 0x96a   :  { %965 = vrot.lane.b32.xlu1 %v2712_v24, %s2825_s25  ;;  %v2714_v25 = vpop.eup %2713 }
 0x96b   :  { %v2716_v33 = vpop.eup %2715  ;;  %v942_v34 = vadd.f32 1.0, %v2714_v25 }
 0x96c   :  { %v943_v35 = vadd.f32 1.0, %v2716_v33 }
 0x96d   :  { %953 = vrot.lane.b32.xlu0 %v951_v27, %s2825_s25  ;;  %2717 = vrcp.f32 %v942_v34 }
 0x96e   :  { %955 = vrot.lane.b32.xlu1 %v952_v28, %s2825_s25  ;;  %2719 = vrcp.f32 %v943_v35 }
 0x97a   :  { %v2718_v36 = vpop.eup %2717 }
 0x97b   :  { %v2720_v38 = vpop.eup %2719 }
 0x9db   :  { %v964_v37 = vpop.permute.xlu0 %963 }
 0x9dc   :  { %v966_v39 = vpop.permute.xlu1 %965  ;;  %v969_v40 = vmul.f32 %v2718_v36, %v964_v37 }
 0x9dd   :  { %v970_v41 = vmul.f32 %v2720_v38, %v966_v39 }
 0x9de   :  { %973 = vrot.lane.b32.xlu0 %v969_v40, %s2825_s25 }
 0x9df   :  { %975 = vrot.lane.b32.xlu1 %v970_v41, %s2825_s25  ;;  %v954_v42 = vpop.permute.xlu0 %953 }
 0x9e0   :  { %v956_v43 = vpop.permute.xlu1 %955  ;;  %v959_v44 = vmul.f32 %v2718_v36, %v954_v42 }
 0x9e1   :  { %v960_v45 = vmul.f32 %v2720_v38, %v956_v43 }
 0xa50   :  { %v974_v46 = vpop.permute.xlu0 %973 }
 0xa51   :  { %v976_v47 = vpop.permute.xlu1 %975  ;;  %v979_v48 = vadd.f32 %v974_v46, %v959_v44 }
 0xa52   :  { %v980_v49 = vadd.f32 %v976_v47, %v960_v45 }
 0xa53   :  { %2721 = vtanh.f32 %v979_v48  ;;  %v1003_v55 = vrot.slane %v979_v48, 2 }
 0xa54   :  { %2723 = vtanh.f32 %v980_v49  ;;  %v1004_v54 = vrot.slane %v980_v49, 1 }
 0xa56   :  { %v1005_v56 = vsel %vm722_vm6, %v1004_v54, %v1003_v55 }
 0xa60   :  { %v2722_v51 = vpop.eup %2721 }
 0xa61   :  { %v2724_v52 = vpop.eup %2723  ;;  %985 = vrot.lane.b32.xlu0 %v2722_v51, %s2825_s25  ;;  %v2388_v51 = vsel %vm1137_vm10, 1.0, %v2823_v29 }
 0xa62   :  { %987 = vrot.lane.b32.xlu1 %v2724_v52, %s2825_s25  ;;  %v1154_v54 = vsub.f32 1.0, %v2388_v51 }
 0xa65   :  { %998 = vperm.xlu0 %2634, %v2384_v50  }
 0xa66   :  { %1013 = vperm.xlu1 %2633, %v1010_v53  }
 0xa6a   :  { %1006 = vrot.lane.b32.xlu1 %v1005_v56, %s2828_s0 }
 0xad3   :  { %v986_v58 = vpop.permute.xlu0 %985 }
 0xad4   :  { %v988_v59 = vpop.permute.xlu1 %987  ;;  %v991_v60 = vmul.f32 %v2718_v36, %v986_v58 }
 0xad5   :  { %v992_v61 = vmul.f32 %v2720_v38, %v988_v59 }
 0xad6   :  { %v1020_v62 = vrot.slane %v991_v60, 2 }
 0xad7   :  { %v1021_v63 = vrot.slane %v992_v61, 1 }
 0xad9   :  { %v1022_v0 = vsel %vm722_vm6, %v1021_v63, %v1020_v62 }
 0xada   :  { %1023 = vrot.lane.b32.xlu0 %v1022_v0, %s2827_s10 }
 0xae0   :  { %v999_v3 = vpop.permute.xlu0 %998 }
 0xae1   :  { %v1014_v4 = vpop.permute.xlu1 %1013 }
 0xae2   :  { %v1027_v6 = vmul.f32 %v1014_v4, %v3139_v7  ;;  %v1016_v23 = vmul.f32 %v1014_v4, %v3153_v21 }
 0xae5   :  { %v1007_v18 = vpop.permute.xlu1 %1006 }
 0xae6   :  { %v1009_v19 = vmul.f32 %v1007_v18, %v999_v3 }
 0xae8   :  { %v3186_v24 = vadd.f32 %v1016_v23, %v1009_v19 }
 0xaea   :  { %v1095_v30 = vrot.slane %v3186_v24, 5  ;;  %v1096_v31 = vrot.slane %v3186_v24, 6 }
 0xb4c   :  { %v1024_v5 = vpop.permute.xlu0 %1023 }
 0xb4d   :  { %v1026_v8 = vmul.f32 %v1024_v5, %v999_v3 }
 0xb4f   :  { %v3172_v9 = vadd.f32 %v1027_v6, %v1026_v8 }
 0xb51   :  { %v1029_v10 = vpack.c.bf16 %v3172_v9, %v3172_v9 }
 0xb53   :  { %2543 = vmatmul.mubr.msk.bf16.vlgmr.msra.gmra.mxu1 %vm358_vm3, %v1029_v10 }
 0xb54   :  { %2555 = vmatpush3.bf16.msra.mxu1 %v3040_v1  ;;  %2558 = vmatprep.mubr.msk.bf16.mxu1 %vm2824_vm0, %v2823_v29 }
 0xb55   :  { %2556 = vmatprep.subr.bf16.mxu1 %v2823_v29 }
 0xb58   :  { %2557 = vmatpush3.bf16.msra.mxu1 %v3048_v2 }
 0xb59   :  { %2570 = vmatprep.subr.bf16.mxu1 %v2823_v29 }
 0xc13   :  { %v1067_v7 = vpop.f32.mrf.mxu1 }
 0xc14   :  { %v1074_v11 = vrot.slane %v1067_v7, 5  ;;  %v1075_v12 = vrot.slane %v1067_v7, 6 }
 0xc15   :  { %v2544_v13 = vpop.f32.mrf.mxu1 }
 0xc16   :  { %v1078_v14 = vadd.f32 %v1074_v11, %v3084_v26  ;;  %v1079_v15 = vadd.f32 %v1075_v12, %v3087_v32 }
 0xc17   :  { %v1070_v16 = vpop.f32.mrf.mxu1 }
 0xc18   :  { %2725 = vtanh.f32 %v1078_v14  ;;  %v2386_v25 = vmul.f32 -1.442695, %v1078_v14  ;;  %v2387_v33 = vmul.f32 -1.442695, %v1079_v15 }
 0xc19   :  { %2727 = vtanh.f32 %v1079_v15  ;;  %v2545_v17 = vpop.f32.mrf.mxu1 }
 0xc1a   :  { %2729 = vpow2.f32 %v2386_v25 }
 0xc1b   :  { %2731 = vpow2.f32 %v2387_v33 }
 0xc25   :  { %v2726_v27 = vpop.eup %2725 }
 0xc26   :  { %v2728_v28 = vpop.eup %2727  ;;  %1107 = vrot.lane.b32.xlu0 %v2726_v27, %s2825_s25 }
 0xc27   :  { %1109 = vrot.lane.b32.xlu1 %v2728_v28, %s2825_s25  ;;  %v2730_v21 = vpop.eup %2729 }
 0xc28   :  { %v2732_v34 = vpop.eup %2731  ;;  %v1086_v35 = vadd.f32 1.0, %v2730_v21 }
 0xc29   :  { %v1087_v36 = vadd.f32 1.0, %v2732_v34 }
 0xc2a   :  { %1097 = vrot.lane.b32.xlu0 %v1095_v30, %s2825_s25  ;;  %2733 = vrcp.f32 %v1086_v35 }
 0xc2b   :  { %1099 = vrot.lane.b32.xlu1 %v1096_v31, %s2825_s25  ;;  %2735 = vrcp.f32 %v1087_v36 }
 0xc37   :  { %v2734_v37 = vpop.eup %2733 }
 0xc38   :  { %v2736_v39 = vpop.eup %2735 }
 0xc98   :  { %v1108_v38 = vpop.permute.xlu0 %1107 }
 0xc99   :  { %v1110_v40 = vpop.permute.xlu1 %1109  ;;  %v1113_v41 = vmul.f32 %v2734_v37, %v1108_v38 }
 0xc9a   :  { %v1114_v42 = vmul.f32 %v2736_v39, %v1110_v40 }
 0xc9b   :  { %1117 = vrot.lane.b32.xlu0 %v1113_v41, %s2825_s25 }
 0xc9c   :  { %1119 = vrot.lane.b32.xlu1 %v1114_v42, %s2825_s25  ;;  %v1098_v43 = vpop.permute.xlu0 %1097 }
 0xc9d   :  { %v1100_v44 = vpop.permute.xlu1 %1099  ;;  %v1103_v45 = vmul.f32 %v2734_v37, %v1098_v43 }
 0xc9e   :  { %v1104_v46 = vmul.f32 %v2736_v39, %v1100_v44 }
 0xd0d   :  { %v1118_v47 = vpop.permute.xlu0 %1117 }
 0xd0e   :  { %v1120_v48 = vpop.permute.xlu1 %1119  ;;  %v1123_v49 = vadd.f32 %v1118_v47, %v1103_v45 }
 0xd0f   :  { %v1124_v50 = vadd.f32 %v1120_v48, %v1104_v46 }
 0xd10   :  { %2737 = vtanh.f32 %v1123_v49  ;;  %v1147_v56 = vrot.slane %v1123_v49, 3 }
 0xd11   :  { %2739 = vtanh.f32 %v1124_v50  ;;  %v1148_v55 = vrot.slane %v1124_v50, 2 }
 0xd13   :  { %v1149_v58 = vsel %vm722_vm6, %v1148_v55, %v1147_v56 }
 0xd1d   :  { %v2738_v52 = vpop.eup %2737 }
 0xd1e   :  { %v2740_v53 = vpop.eup %2739  ;;  %1129 = vrot.lane.b32.xlu0 %v2738_v52, %s2825_s25  ;;  %v2392_v52 = vsel %vm1281_vm11, 1.0, %v2823_v29 }
 0xd1f   :  { %1131 = vrot.lane.b32.xlu1 %v2740_v53, %s2825_s25  ;;  %v1298_v55 = vsub.f32 1.0, %v2392_v52 }
 0xd22   :  { %1142 = vperm.xlu0 %2634, %v2388_v51  }
 0xd23   :  { %1157 = vperm.xlu1 %2633, %v1154_v54  }
 0xd27   :  { %1150 = vrot.lane.b32.xlu1 %v1149_v58, %s2828_s0 }
 0xd90   :  { %v1130_v59 = vpop.permute.xlu0 %1129 }
 0xd91   :  { %v1132_v60 = vpop.permute.xlu1 %1131  ;;  %v1135_v61 = vmul.f32 %v2734_v37, %v1130_v59 }
 0xd92   :  { %v1136_v62 = vmul.f32 %v2736_v39, %v1132_v60 }
 0xd93   :  { %v1164_v63 = vrot.slane %v1135_v61, 3 }
 0xd94   :  { %v1165_v0 = vrot.slane %v1136_v62, 2 }
 0xd96   :  { %v1166_v3 = vsel %vm722_vm6, %v1165_v0, %v1164_v63 }
 0xd97   :  { %1167 = vrot.lane.b32.xlu0 %v1166_v3, %s2827_s10 }
 0xd9d   :  { %v1143_v4 = vpop.permute.xlu0 %1142 }
 0xd9e   :  { %v1158_v5 = vpop.permute.xlu1 %1157 }
 0xd9f   :  { %v1171_v8 = vmul.f32 %v1158_v5, %v3172_v9  ;;  %v1160_v27 = vmul.f32 %v1158_v5, %v3186_v24 }
 0xda2   :  { %v1151_v19 = vpop.permute.xlu1 %1150 }
 0xda3   :  { %v1153_v23 = vmul.f32 %v1151_v19, %v1143_v4 }
 0xda5   :  { %v3219_v28 = vadd.f32 %v1160_v27, %v1153_v23 }
 0xda7   :  { %v1239_v25 = vrot.slane %v3219_v28, 4  ;;  %v1240_v33 = vrot.slane %v3219_v28, 5 }
 0xe09   :  { %v1168_v6 = vpop.permute.xlu0 %1167 }
 0xe0a   :  { %v1170_v10 = vmul.f32 %v1168_v6, %v1143_v4 }
 0xe0c   :  { %v3205_v7 = vadd.f32 %v1171_v8, %v1170_v10 }
 0xe0e   :  { %v1173_v11 = vpack.c.bf16 %v3205_v7, %v3205_v7 }
 0xe10   :  { %2551 = vmatmul.mubr.msk.bf16.vlgmr.msra.gmra.mxu0 %vm358_vm3, %v1173_v11 }
 0xe11   :  { %2563 = vmatpush3.bf16.msra.mxu0 %v3040_v1  ;;  %2566 = vmatprep.mubr.msk.bf16.mxu0 %vm2824_vm0, %v2823_v29 }
 0xe12   :  { %2564 = vmatprep.subr.bf16.mxu0 %v2823_v29 }
 0xe15   :  { %2565 = vmatpush3.bf16.msra.mxu0 %v3048_v2 }
 0xe16   :  { %2578 = vmatprep.subr.bf16.mxu0 %v2823_v29 }
 0xed0   :  { %v1211_v9 = vpop.f32.mrf.mxu0 }
 0xed1   :  { %v1218_v12 = vrot.slane %v1211_v9, 4  ;;  %v1219_v13 = vrot.slane %v1211_v9, 5 }
 0xed2   :  { %v2552_v14 = vpop.f32.mrf.mxu0 }
 0xed3   :  { %v1222_v15 = vadd.f32 %v1218_v12, %v3084_v26  ;;  %v1223_v16 = vadd.f32 %v1219_v13, %v3087_v32 }
 0xed4   :  { %v1214_v17 = vpop.f32.mrf.mxu0 }
 0xed5   :  { %2741 = vtanh.f32 %v1222_v15  ;;  %v2390_v21 = vmul.f32 -1.442695, %v1222_v15  ;;  %v2391_v34 = vmul.f32 -1.442695, %v1223_v16 }
 0xed6   :  { %2743 = vtanh.f32 %v1223_v16  ;;  %v2553_v18 = vpop.f32.mrf.mxu0 }
 0xed7   :  { %2745 = vpow2.f32 %v2390_v21 }
 0xed8   :  { %2747 = vpow2.f32 %v2391_v34 }
 0xee2   :  { %v2742_v30 = vpop.eup %2741 }
 0xee3   :  { %v2744_v31 = vpop.eup %2743  ;;  %1251 = vrot.lane.b32.xlu0 %v2742_v30, %s2825_s25 }
 0xee4   :  { %1253 = vrot.lane.b32.xlu1 %v2744_v31, %s2825_s25  ;;  %v2746_v24 = vpop.eup %2745 }
 0xee5   :  { %v2748_v35 = vpop.eup %2747  ;;  %v1230_v36 = vadd.f32 1.0, %v2746_v24 }
 0xee6   :  { %v1231_v37 = vadd.f32 1.0, %v2748_v35 }
 0xee7   :  { %1241 = vrot.lane.b32.xlu0 %v1239_v25, %s2825_s25  ;;  %2749 = vrcp.f32 %v1230_v36 }
 0xee8   :  { %1243 = vrot.lane.b32.xlu1 %v1240_v33, %s2825_s25  ;;  %2751 = vrcp.f32 %v1231_v37 }
 0xef4   :  { %v2750_v38 = vpop.eup %2749 }
 0xef5   :  { %v2752_v40 = vpop.eup %2751 }
 0xf55   :  { %v1252_v39 = vpop.permute.xlu0 %1251 }
 0xf56   :  { %v1254_v41 = vpop.permute.xlu1 %1253  ;;  %v1257_v42 = vmul.f32 %v2750_v38, %v1252_v39 }
 0xf57   :  { %v1258_v43 = vmul.f32 %v2752_v40, %v1254_v41 }
 0xf58   :  { %1261 = vrot.lane.b32.xlu0 %v1257_v42, %s2825_s25 }
 0xf59   :  { %1263 = vrot.lane.b32.xlu1 %v1258_v43, %s2825_s25  ;;  %v1242_v44 = vpop.permute.xlu0 %1241 }
 0xf5a   :  { %v1244_v45 = vpop.permute.xlu1 %1243  ;;  %v1247_v46 = vmul.f32 %v2750_v38, %v1242_v44 }
 0xf5b   :  { %v1248_v47 = vmul.f32 %v2752_v40, %v1244_v45 }
 0xfca   :  { %v1262_v48 = vpop.permute.xlu0 %1261 }
 0xfcb   :  { %v1264_v49 = vpop.permute.xlu1 %1263  ;;  %v1267_v50 = vadd.f32 %v1262_v48, %v1247_v46 }
 0xfcc   :  { %v1268_v51 = vadd.f32 %v1264_v49, %v1248_v47 }
 0xfcd   :  { %2753 = vtanh.f32 %v1267_v50  ;;  %v1291_v58 = vrot.slane %v1267_v50, 4 }
 0xfce   :  { %2755 = vtanh.f32 %v1268_v51  ;;  %v1292_v56 = vrot.slane %v1268_v51, 3  ;;  %v2396_v51 = vsel %vm1425_vm12, 1.0, %v2823_v29 }
 0xfd0   :  { %v1293_v59 = vsel %vm722_vm6, %v1292_v56, %v1291_v58 }
 0xfda   :  { %v2754_v53 = vpop.eup %2753 }
 0xfdb   :  { %v2756_v54 = vpop.eup %2755  ;;  %1273 = vrot.lane.b32.xlu0 %v2754_v53, %s2825_s25 }
 0xfdc   :  { %1275 = vrot.lane.b32.xlu1 %v2756_v54, %s2825_s25  ;;  %v1442_v54 = vsub.f32 1.0, %v2396_v51 }
 0xfdf   :  { %1286 = vperm.xlu0 %2634, %v2392_v52  }
 0xfe0   :  { %1301 = vperm.xlu1 %2633, %v1298_v55  }
 0xfe4   :  { %1294 = vrot.lane.b32.xlu1 %v1293_v59, %s2828_s0 }
0x104d   :  { %v1274_v60 = vpop.permute.xlu0 %1273 }
0x104e   :  { %v1276_v61 = vpop.permute.xlu1 %1275  ;;  %v1279_v62 = vmul.f32 %v2750_v38, %v1274_v60 }
0x104f   :  { %v1280_v63 = vmul.f32 %v2752_v40, %v1276_v61 }
0x1050   :  { %v1308_v0 = vrot.slane %v1279_v62, 4 }
0x1051   :  { %v1309_v3 = vrot.slane %v1280_v63, 3 }
0x1053   :  { %v1310_v4 = vsel %vm722_vm6, %v1309_v3, %v1308_v0 }
0x1054   :  { %1311 = vrot.lane.b32.xlu0 %v1310_v4, %s2827_s10 }
0x105a   :  { %v1287_v5 = vpop.permute.xlu0 %1286 }
0x105b   :  { %v1302_v6 = vpop.permute.xlu1 %1301 }
0x105c   :  { %v1315_v10 = vmul.f32 %v1302_v6, %v3205_v7  ;;  %v1304_v27 = vmul.f32 %v1302_v6, %v3219_v28 }
0x105f   :  { %v1295_v19 = vpop.permute.xlu1 %1294 }
0x1060   :  { %v1297_v23 = vmul.f32 %v1295_v19, %v1287_v5 }
0x1062   :  { %v3252_v30 = vadd.f32 %v1304_v27, %v1297_v23 }
0x1064   :  { %v1383_v25 = vrot.slane %v3252_v30, 3  ;;  %v1384_v33 = vrot.slane %v3252_v30, 4 }
0x10c6   :  { %v1312_v8 = vpop.permute.xlu0 %1311 }
0x10c7   :  { %v1314_v11 = vmul.f32 %v1312_v8, %v1287_v5 }
0x10c9   :  { %v3238_v9 = vadd.f32 %v1315_v10, %v1314_v11 }
0x10cb   :  { %v1317_v12 = vpack.c.bf16 %v3238_v9, %v3238_v9 }
0x10cd   :  { %2559 = vmatmul.mubr.msk.bf16.vlgmr.msra.gmra.mxu1 %vm358_vm3, %v1317_v12 }
0x10ce   :  { %2571 = vmatpush3.bf16.msra.mxu1 %v3040_v1  ;;  %2574 = vmatprep.mubr.msk.bf16.mxu1 %vm2824_vm0, %v2823_v29 }
0x10cf   :  { %2572 = vmatprep.subr.bf16.mxu1 %v2823_v29 }
0x10d2   :  { %2573 = vmatpush3.bf16.msra.mxu1 %v3048_v2 }
0x10d3   :  { %2586 = vmatprep.subr.bf16.mxu1 %v2823_v29 }
0x118d   :  { %v1355_v7 = vpop.f32.mrf.mxu1 }
0x118e   :  { %v1362_v13 = vrot.slane %v1355_v7, 3  ;;  %v1363_v14 = vrot.slane %v1355_v7, 4 }
0x118f   :  { %v2560_v15 = vpop.f32.mrf.mxu1 }
0x1190   :  { %v1366_v16 = vadd.f32 %v1362_v13, %v3084_v26  ;;  %v1367_v17 = vadd.f32 %v1363_v14, %v3087_v32 }
0x1191   :  { %v1358_v18 = vpop.f32.mrf.mxu1 }
0x1192   :  { %2757 = vtanh.f32 %v1366_v16  ;;  %v2394_v21 = vmul.f32 -1.442695, %v1366_v16  ;;  %v2395_v34 = vmul.f32 -1.442695, %v1367_v17 }
0x1193   :  { %2759 = vtanh.f32 %v1367_v17  ;;  %v2561_v1 = vpop.f32.mrf.mxu1 }
0x1194   :  { %2761 = vpow2.f32 %v2394_v21 }
0x1195   :  { %2763 = vpow2.f32 %v2395_v34 }
0x119f   :  { %v2758_v2 = vpop.eup %2757 }
0x11a0   :  { %v2760_v31 = vpop.eup %2759  ;;  %1395 = vrot.lane.b32.xlu0 %v2758_v2, %s2825_s25 }
0x11a1   :  { %1397 = vrot.lane.b32.xlu1 %v2760_v31, %s2825_s25  ;;  %v2762_v28 = vpop.eup %2761 }
0x11a2   :  { %v2764_v24 = vpop.eup %2763  ;;  %v1374_v35 = vadd.f32 1.0, %v2762_v28 }
0x11a3   :  { %v1375_v36 = vadd.f32 1.0, %v2764_v24 }
0x11a4   :  { %1385 = vrot.lane.b32.xlu0 %v1383_v25, %s2825_s25  ;;  %2765 = vrcp.f32 %v1374_v35 }
0x11a5   :  { %1387 = vrot.lane.b32.xlu1 %v1384_v33, %s2825_s25  ;;  %2767 = vrcp.f32 %v1375_v36 }
0x11b1   :  { %v2766_v37 = vpop.eup %2765 }
0x11b2   :  { %v2768_v39 = vpop.eup %2767 }
0x1212   :  { %v1396_v38 = vpop.permute.xlu0 %1395 }
0x1213   :  { %v1398_v40 = vpop.permute.xlu1 %1397  ;;  %v1401_v41 = vmul.f32 %v2766_v37, %v1396_v38 }
0x1214   :  { %v1402_v42 = vmul.f32 %v2768_v39, %v1398_v40 }
0x1215   :  { %1405 = vrot.lane.b32.xlu0 %v1401_v41, %s2825_s25 }
0x1216   :  { %1407 = vrot.lane.b32.xlu1 %v1402_v42, %s2825_s25  ;;  %v1386_v43 = vpop.permute.xlu0 %1385 }
0x1217   :  { %v1388_v44 = vpop.permute.xlu1 %1387  ;;  %v1391_v45 = vmul.f32 %v2766_v37, %v1386_v43 }
0x1218   :  { %v1392_v46 = vmul.f32 %v2768_v39, %v1388_v44 }
0x1287   :  { %v1406_v47 = vpop.permute.xlu0 %1405 }
0x1288   :  { %v1408_v48 = vpop.permute.xlu1 %1407  ;;  %v1411_v49 = vadd.f32 %v1406_v47, %v1391_v45 }
0x1289   :  { %v1412_v50 = vadd.f32 %v1408_v48, %v1392_v46 }
0x128a   :  { %2769 = vtanh.f32 %v1411_v49  ;;  %v1435_v56 = vrot.slane %v1411_v49, 5 }
0x128b   :  { %2771 = vtanh.f32 %v1412_v50  ;;  %v1436_v55 = vrot.slane %v1412_v50, 4  ;;  %v2400_v50 = vsel %vm1569_vm13, 1.0, %v2823_v29 }
0x128d   :  { %v1437_v58 = vsel %vm722_vm6, %v1436_v55, %v1435_v56 }
0x1297   :  { %v2770_v52 = vpop.eup %2769 }
0x1298   :  { %v2772_v53 = vpop.eup %2771  ;;  %1417 = vrot.lane.b32.xlu0 %v2770_v52, %s2825_s25 }
0x1299   :  { %1419 = vrot.lane.b32.xlu1 %v2772_v53, %s2825_s25  ;;  %v1586_v53 = vsub.f32 1.0, %v2400_v50 }
0x129c   :  { %1430 = vperm.xlu0 %2634, %v2396_v51  }
0x129d   :  { %1445 = vperm.xlu1 %2633, %v1442_v54  }
0x12a1   :  { %1438 = vrot.lane.b32.xlu1 %v1437_v58, %s2828_s0 }
0x130a   :  { %v1418_v59 = vpop.permute.xlu0 %1417 }
0x130b   :  { %v1420_v60 = vpop.permute.xlu1 %1419  ;;  %v1423_v61 = vmul.f32 %v2766_v37, %v1418_v59 }
0x130c   :  { %v1424_v62 = vmul.f32 %v2768_v39, %v1420_v60 }
0x130d   :  { %v1452_v63 = vrot.slane %v1423_v61, 5 }
0x130e   :  { %v1453_v0 = vrot.slane %v1424_v62, 4 }
0x1310   :  { %v1454_v3 = vsel %vm722_vm6, %v1453_v0, %v1452_v63 }
0x1311   :  { %1455 = vrot.lane.b32.xlu0 %v1454_v3, %s2827_s10 }
0x1317   :  { %v1431_v4 = vpop.permute.xlu0 %1430 }
0x1318   :  { %v1446_v5 = vpop.permute.xlu1 %1445 }
0x1319   :  { %v1459_v8 = vmul.f32 %v1446_v5, %v3238_v9  ;;  %v1448_v23 = vmul.f32 %v1446_v5, %v3252_v30 }
0x131c   :  { %v1439_v1 = vpop.permute.xlu1 %1438 }
0x131d   :  { %v1441_v19 = vmul.f32 %v1439_v1, %v1431_v4 }
0x131f   :  { %v3281_v27 = vadd.f32 %v1448_v23, %v1441_v19 }
0x1321   :  { %v1527_v25 = vrot.slane %v3281_v27, 2  ;;  %v1528_v33 = vrot.slane %v3281_v27, 3 }
0x1383   :  { %v1456_v6 = vpop.permute.xlu0 %1455 }
0x1384   :  { %v1458_v10 = vmul.f32 %v1456_v6, %v1431_v4 }
0x1386   :  { %v3271_v11 = vadd.f32 %v1459_v8, %v1458_v10  ;;  %v2367_v10 = vld [vmem:[%s3520_s15] ss:$0 sm:$0xff] }
0x1388   :  { %v1461_v12 = vpack.c.bf16 %v3271_v11, %v3271_v11 }
0x138a   :  { %2567 = vmatmul.mubr.msk.bf16.vlgmr.msra.gmra.mxu0 %vm358_vm3, %v1461_v12  ;;  %v2665_v12 = vld [vmem:[%s3519_s16 + $0x8] sm:$0xff]  }
0x138b   :  { %2582 = vmatprep.mubr.msk.bf16.mxu0 %vm2824_vm0, %v2823_v29 }
0x144a   :  { %v1499_v7 = vpop.f32.mrf.mxu0 }
0x144b   :  { %v1506_v13 = vrot.slane %v1499_v7, 2  ;;  %v1507_v14 = vrot.slane %v1499_v7, 3  ;;  %v525_v7 = vadd.f32 %v2367_v10, %v3079_v22 }
0x144c   :  { %v2568_v15 = vpop.f32.mrf.mxu0 }
0x144d   :  { %v1510_v16 = vadd.f32 %v1506_v13, %v3084_v26  ;;  %v1511_v17 = vadd.f32 %v1507_v14, %v3087_v32  ;;  %v524_v14 = vadd.f32 %v2367_v10, %v3077_v20  ;;  %v3318_v15 = vmax.f32 %v525_v7, 0.0 }
0x144e   :  { %v1502_v9 = vpop.f32.mrf.mxu0 }
0x144f   :  { %2773 = vtanh.f32 %v1510_v16  ;;  %v2398_v21 = vmul.f32 -1.442695, %v1510_v16  ;;  %v2399_v34 = vmul.f32 -1.442695, %v1511_v17  ;;  %v3321_v22 = vmax.f32 %v524_v14, 0.0 }
0x1450   :  { %2775 = vtanh.f32 %v1511_v17  ;;  %v2569_v18 = vpop.f32.mrf.mxu0 }
0x1451   :  { %2777 = vpow2.f32 %v2398_v21  ;;  %v1806_v20 = vpack.c.bf16 %v3318_v15, %v3321_v22 }
0x1452   :  { %2779 = vpow2.f32 %v2399_v34 }
0x145c   :  { %v2774_v2 = vpop.eup %2773 }
0x145d   :  { %v2776_v31 = vpop.eup %2775  ;;  %1539 = vrot.lane.b32.xlu0 %v2774_v2, %s2825_s25 }
0x145e   :  { %1541 = vrot.lane.b32.xlu1 %v2776_v31, %s2825_s25  ;;  %v2778_v30 = vpop.eup %2777 }
0x145f   :  { %v2780_v28 = vpop.eup %2779  ;;  %v1518_v24 = vadd.f32 1.0, %v2778_v30 }
0x1460   :  { %v1519_v35 = vadd.f32 1.0, %v2780_v28 }
0x1461   :  { %1529 = vrot.lane.b32.xlu0 %v1527_v25, %s2825_s25  ;;  %2781 = vrcp.f32 %v1518_v24 }
0x1462   :  { %1531 = vrot.lane.b32.xlu1 %v1528_v33, %s2825_s25  ;;  %2783 = vrcp.f32 %v1519_v35 }
0x146e   :  { %v2782_v36 = vpop.eup %2781 }
0x146f   :  { %v2784_v38 = vpop.eup %2783 }
0x14cf   :  { %v1540_v37 = vpop.permute.xlu0 %1539 }
0x14d0   :  { %v1542_v39 = vpop.permute.xlu1 %1541  ;;  %v1545_v40 = vmul.f32 %v2782_v36, %v1540_v37 }
0x14d1   :  { %v1546_v41 = vmul.f32 %v2784_v38, %v1542_v39 }
0x14d2   :  { %1549 = vrot.lane.b32.xlu0 %v1545_v40, %s2825_s25 }
0x14d3   :  { %1551 = vrot.lane.b32.xlu1 %v1546_v41, %s2825_s25  ;;  %v1530_v42 = vpop.permute.xlu0 %1529 }
0x14d4   :  { %v1532_v43 = vpop.permute.xlu1 %1531  ;;  %v1535_v44 = vmul.f32 %v2782_v36, %v1530_v42 }
0x14d5   :  { %v1536_v45 = vmul.f32 %v2784_v38, %v1532_v43 }
0x1544   :  { %v1550_v46 = vpop.permute.xlu0 %1549 }
0x1545   :  { %v1552_v47 = vpop.permute.xlu1 %1551  ;;  %v1555_v48 = vadd.f32 %v1550_v46, %v1535_v44 }
0x1546   :  { %v1556_v49 = vadd.f32 %v1552_v47, %v1536_v45 }
0x1547   :  { %2785 = vtanh.f32 %v1555_v48  ;;  %v1579_v55 = vrot.slane %v1555_v48, 6 }
0x1548   :  { %2787 = vtanh.f32 %v1556_v49  ;;  %v1580_v54 = vrot.slane %v1556_v49, 5 }
0x154a   :  { %v1581_v56 = vsel %vm722_vm6, %v1580_v54, %v1579_v55 }
0x1554   :  { %v2786_v51 = vpop.eup %2785 }
0x1555   :  { %v2788_v52 = vpop.eup %2787  ;;  %1561 = vrot.lane.b32.xlu0 %v2786_v51, %s2825_s25 }
0x1556   :  { %1563 = vrot.lane.b32.xlu1 %v2788_v52, %s2825_s25 }
0x1559   :  { %1574 = vperm.xlu0 %2634, %v2400_v50  }
0x155a   :  { %1589 = vperm.xlu1 %2633, %v1586_v53  }
0x155e   :  { %1582 = vrot.lane.b32.xlu1 %v1581_v56, %s2828_s0  ;;  %v2821_v56 = vld [vmem:[%s3518_s6] sm:$0x3] }
0x155f   :  { %vm1713_vm14 = vcmp.gt.f32.partialorder %v2821_v56, 7.0 }
0x15c7   :  { %v1562_v58 = vpop.permute.xlu0 %1561 }
0x15c8   :  { %v1564_v59 = vpop.permute.xlu1 %1563  ;;  %v1567_v57 = vmul.f32 %v2782_v36, %v1562_v58  ;;  %v2404_v58 = vsel %vm1713_vm14, 1.0, %v2823_v29 }
0x15c9   :  { %v1568_v60 = vmul.f32 %v2784_v38, %v1564_v59 }
0x15ca   :  { %v1596_v61 = vrot.slane %v1567_v57, 6 }
0x15cb   :  { %v1597_v62 = vrot.slane %v1568_v60, 5  ;;  %v1730_v60 = vsub.f32 1.0, %v2404_v58 }
0x15cd   :  { %v1598_v63 = vsel %vm722_vm6, %v1597_v62, %v1596_v61  ;;  %v2667_v61 = vld [vmem:[%s3521_s12 + $0x8] sm:$0xff]   ;;  %v2668_v62 = vld [vmem:[%s3521_s12] sm:$0xff]  }
0x15ce   :  { %1599 = vrot.lane.b32.xlu0 %v1598_v63, %s2827_s10  ;;  %2579 = vmatpush3.bf16.msra.mxu0 %v2667_v61 }
0x15cf   :  { %2580 = vmatprep.subr.bf16.mxu0 %v2823_v29 }
0x15d2   :  { %2581 = vmatpush3.bf16.msra.mxu0 %v2668_v62  ;;  %v3423_v62 = vld [vmem:[%s3527_s3] sm:$0x3] }
0x15d3   :  { %2594 = vmatprep.subr.bf16.mxu0 %v2823_v29  ;;  %vm1868_vm15 = vcmp.gt.f32.partialorder %v3423_v62, 0.5 }
0x15d4   :  { %v1575_v0 = vpop.permute.xlu0 %1574 }
0x15d5   :  { %v1590_v3 = vpop.permute.xlu1 %1589 }
0x15d6   :  { %v1603_v5 = vmul.f32 %v1590_v3, %v3271_v11  ;;  %v2666_v11 = vld [vmem:[%s3519_s16] sm:$0xff]   ;;  %v1592_v28 = vmul.f32 %v1590_v3, %v3281_v27 }
0x15d9   :  { %v1583_v25 = vpop.permute.xlu1 %1582 }
0x15da   :  { %v1585_v34 = vmul.f32 %v1583_v25, %v1575_v0 }
0x15dc   :  { %v1593_v24 = vadd.f32 %v1592_v28, %v1585_v34  ;;  %v2829_v34 = vmov 1966171168   ;;  %v1942_v28 = vlaneseq }
0x15de   :  { %v1995_v56 = vand.u32 127, %v1942_v28 }
0x1640   :  { %v1600_v4 = vpop.permute.xlu0 %1599 }
0x1641   :  { %v1602_v6 = vmul.f32 %v1600_v4, %v1575_v0 }
0x1643   :  { %v3300_v8 = vadd.f32 %v1603_v5, %v1602_v6 }
0x1645   :  { %v1605_v13 = vpack.c.bf16 %v3300_v8, %v3300_v8 }
0x1647   :  { %2575 = vmatmul.mubr.msk.bf16.vlgmr.msra.gmra.mxu1 %vm358_vm3, %v1605_v13 }
0x1648   :  { %2587 = vmatpush3.bf16.msra.mxu1 %v2665_v12  ;;  %2590 = vmatprep.mubr.msk.bf16.mxu1 %vm2824_vm0, %v2823_v29 }
0x1649   :  { %2588 = vmatprep.subr.bf16.mxu1 %v2823_v29 }
0x164c   :  { %2589 = vmatpush3.bf16.msra.mxu1 %v2666_v11 }
0x164d   :  { %2602 = vmatprep.subr.bf16.mxu1 %v2823_v29 }
0x164f   :  { %2591 = vmatmul.mubr.msk.bf16.vlgmr.msra.gmra.mxu1 %vm358_vm3, %v1806_v20 }
0x1650   :  { %2606 = vmatprep.mubr.msk.bf16.mxu1 %vm2824_vm0, %v2823_v29 }
0x1707   :  { %v1643_v16 = vpop.f32.mrf.mxu1 }
0x1708   :  { %v1650_v17 = vrot.slane %v1643_v16, 1  ;;  %v1651_v9 = vrot.slane %v1643_v16, 2 }
0x1709   :  { %v2576_v18 = vpop.f32.mrf.mxu1 }
0x170a   :  { %v1654_v1 = vadd.f32 %v1650_v17, %v3084_v26  ;;  %v1655_v19 = vadd.f32 %v1651_v9, %v3087_v32  ;;  %v1671_v26 = vrot.slane %v1593_v24, 1  ;;  %v1672_v32 = vrot.slane %v1593_v24, 2  ;;  %v2669_v17 = vld [vmem:[%s3522_s17 + $0x8] sm:$0xff]   ;;  %v2405_v9 = vld [vmem:[%s3523_s13] ss:$0 sm:$0xff] }
0x170b   :  { %v1646_v23 = vpop.f32.mrf.mxu1  ;;  %2603 = vmatpush3.bf16.msra.mxu1 %v2669_v17 }
0x170c   :  { %2789 = vtanh.f32 %v1654_v1  ;;  %v2402_v37 = vmul.f32 -1.442695, %v1654_v1  ;;  %v2403_v38 = vmul.f32 -1.442695, %v1655_v19  ;;  %2604 = vmatprep.subr.bf16.mxu1 %v2823_v29 }
0x170d   :  { %2791 = vtanh.f32 %v1655_v19  ;;  %v2577_v2 = vpop.f32.mrf.mxu1 }
0x170e   :  { %2793 = vpow2.f32 %v2402_v37 }
0x170f   :  { %v3331_v31 = vpop.f32.mrf.mxu1  ;;  %2795 = vpow2.f32 %v2403_v38 }
0x1711   :  { %v2592_v33 = vpop.f32.mrf.mxu1 }
0x1713   :  { %v3333_v21 = vpop.f32.mrf.mxu1 }
0x1715   :  { %v2593_v30 = vpop.f32.mrf.mxu1 }
0x1716   :  { %v1940_v30 = vunpack.c.l.s4 %v2829_v34 }
0x1718   :  { %v1941_v24 = vunpack.c.0.s8 %v1940_v30 }
0x1719   :  { %v2790_v35 = vpop.eup %2789 }
0x171a   :  { %v2792_v36 = vpop.eup %2791  ;;  %1683 = vrot.lane.b32.xlu0 %v2790_v35, %s2825_s25  ;;  %v3381_v35 = vshrl.u32 %v1942_v28, 7 }
0x171b   :  { %1685 = vrot.lane.b32.xlu1 %v2792_v36, %s2825_s25  ;;  %v2794_v39 = vpop.eup %2793  ;;  %v3386_v36 = vld [vmem:[%s3524_s18] ss:$0 sm:$0xff] }
0x171c   :  { %v2796_v40 = vpop.eup %2795  ;;  %v1662_v27 = vadd.f32 1.0, %v2794_v39 }
0x171d   :  { %v1663_v41 = vadd.f32 1.0, %v2796_v40  ;;  %v3394_v40 = vsub.s32 0, %v3381_v35 }
0x171e   :  { %1673 = vrot.lane.b32.xlu0 %v1671_v26, %s2825_s25  ;;  %2797 = vrcp.f32 %v1662_v27  ;;  %v3389_v26 = vsub.s32 %v1941_v24, %v3381_v35 }
0x171f   :  { %1675 = vrot.lane.b32.xlu1 %v1672_v32, %s2825_s25  ;;  %2799 = vrcp.f32 %v1663_v41 }
0x172b   :  { %v2798_v42 = vpop.eup %2797 }
0x172c   :  { %v2800_v44 = vpop.eup %2799 }
0x178c   :  { %v1684_v43 = vpop.permute.xlu0 %1683 }
0x178d   :  { %v1686_v45 = vpop.permute.xlu1 %1685  ;;  %v1689_v46 = vmul.f32 %v2798_v42, %v1684_v43 }
0x178e   :  { %v1690_v47 = vmul.f32 %v2800_v44, %v1686_v45 }
0x178f   :  { %1693 = vrot.lane.b32.xlu0 %v1689_v46, %s2825_s25 }
0x1790   :  { %1695 = vrot.lane.b32.xlu1 %v1690_v47, %s2825_s25  ;;  %v1674_v48 = vpop.permute.xlu0 %1673 }
0x1791   :  { %v1676_v49 = vpop.permute.xlu1 %1675  ;;  %v1679_v50 = vmul.f32 %v2798_v42, %v1674_v48 }
0x1792   :  { %v1680_v51 = vmul.f32 %v2800_v44, %v1676_v49  ;;  %v3405_v49 = vld [vmem:[%s3525_s19] ss:$0 sm:$0xff] }
0x1801   :  { %v1694_v52 = vpop.permute.xlu0 %1693 }
0x1802   :  { %v1696_v53 = vpop.permute.xlu1 %1695  ;;  %v1699_v54 = vadd.f32 %v1694_v52, %v1679_v50 }
0x1803   :  { %v1700_v55 = vadd.f32 %v1696_v53, %v1680_v51 }
0x1804   :  { %2801 = vtanh.f32 %v1699_v54 }
0x1805   :  { %2803 = vtanh.f32 %v1700_v55 }
0x1811   :  { %v2802_v59 = vpop.eup %2801 }
0x1812   :  { %v2804_v57 = vpop.eup %2803  ;;  %1705 = vrot.lane.b32.xlu0 %v2802_v59, %s2825_s25 }
0x1813   :  { %1707 = vrot.lane.b32.xlu1 %v2804_v57, %s2825_s25  ;;  %v3417_v57 = vsub.s32 %v1995_v56, %v3381_v35 }
0x1816   :  { %1718 = vperm.xlu0 %2634, %v2404_v58   ;;  %v3414_v58 = vstv %s3526_s20 }
0x1817   :  { %1733 = vperm.xlu1 %2633, %v1730_v60  }
0x1884   :  { %v1706_v63 = vpop.permute.xlu0 %1705 }
0x1885   :  { %v1708_v0 = vpop.permute.xlu1 %1707  ;;  %v1711_v3 = vmul.f32 %v2798_v42, %v1706_v63 }
0x1886   :  { %v1712_v4 = vmul.f32 %v2800_v44, %v1708_v0 }
0x1887   :  { %v1723_v5 = vrot.slane %v1711_v3, 7 }
0x1888   :  { %v1724_v6 = vrot.slane %v1712_v4, 6 }
0x188a   :  { %v1725_v10 = vsel %vm722_vm6, %v1724_v6, %v1723_v5 }
0x188b   :  { %1726 = vrot.lane.b32.xlu0 %v1725_v10, %s2827_s10 }
0x1891   :  { %v1719_v12 = vpop.permute.xlu0 %1718 }
0x1892   :  { %v1734_v7 = vpop.permute.xlu1 %1733 }
0x1893   :  { %v1736_v14 = vmul.f32 %v1734_v7, %v3300_v8  ;;  %v2670_v8 = vld [vmem:[%s3522_s17] sm:$0xff]  }
0x1894   :  { %2605 = vmatpush3.bf16.msra.mxu1 %v2670_v8 }
0x18fd   :  { %v1727_v13 = vpop.permute.xlu0 %1726 }
0x18fe   :  { %v1729_v11 = vmul.f32 %v1727_v13, %v1719_v12 }
0x1900   :  { %v1737_v20 = vadd.f32 %v1736_v14, %v1729_v11 }
0x1902   :  { %v1738_v16 = vpack.c.bf16 %v1737_v20, %v1737_v20  ;;  %v2028_v20 = vsub.s32 1, %v3381_v35 }
0x1904   :  { %2583 = vmatmul.mubr.msk.bf16.vlgmr.msra.gmra.mxu0 %vm358_vm3, %v1738_v16 }
0x1905   :  { %2598 = vmatprep.mubr.msk.bf16.mxu0 %vm2824_vm0, %v2823_v29  ;;  %2595 = vmatpush3.bf16.msra.mxu0 %v2669_v17 }
0x1906   :  { %2596 = vmatprep.subr.bf16.mxu0 %v2823_v29 }
0x1909   :  { %2597 = vmatpush3.bf16.msra.mxu0 %v2670_v8 }
0x190a   :  { %2610 = vmatprep.subr.bf16.mxu0 %v2823_v29 }
0x19c4   :  { %v1799_v18 = vpop.f32.mrf.mxu0 }
0x19c5   :  { %v1800_v1 = vadd.f32 %v2405_v9, %v1799_v18 }
0x19c6   :  { %v2584_v19 = vpop.f32.mrf.mxu0 }
0x19c7   :  { %v3374_v23 = vmax.f32 %v1800_v1, 0.0 }
0x19c8   :  { %v1802_v2 = vpop.f32.mrf.mxu0 }
0x19c9   :  { %v1871_v25 = vpack.c.bf16 %v3374_v23, %v3374_v23 }
0x19ca   :  { %v2585_v33 = vpop.f32.mrf.mxu0 }
0x19cb   :  { %2599 = vmatmul.mubr.msk.bf16.vlgmr.msra.gmra.mxu0 %vm358_vm3, %v1871_v25 }
0x19cc   :  { %2614 = vmatprep.mubr.msk.bf16.mxu0 %vm2824_vm0, %v2823_v29  ;;  %vm2007_vm0 = vcmask 58368  }
0x1a8b   :  { %v1932_v32 = vpop.f32.mrf.mxu0 }
0x1a8c   :  { %v1933_v37 = vadd.f32 %v3386_v36, %v1932_v32 }
0x1a8d   :  { %v2600_v38 = vpop.f32.mrf.mxu0 }
0x1a8e   :  { %v1945_v39 = vrot.slane %v1933_v37, %v3389_v26 }
0x1a8f   :  { %v1935_v27 = vpop.f32.mrf.mxu0 }
0x1a90   :  { %v1946_v41 = vcombine.high %v1945_v39, %v1945_v39  ;;  %v1953_v42 = vrot.slane %v1945_v39, %v3389_v26 }
0x1a91   :  { %v2601_v43 = vpop.f32.mrf.mxu0 }
0x1a92   :  { %v1960_v44 = vrot.slane %v1946_v41, %v3389_v26  ;;  %v1964_v45 = vrot.slane %v1953_v42, %v3394_v40 }
0x1a94   :  { %v1968_v46 = vrot.slane %v1960_v44, %v3394_v40  ;;  %v1971_v47 = vadd.f32 %v1964_v45, %v3331_v31 }
0x1a96   :  { %v1972_v48 = vadd.f32 %v1968_v46, %v3333_v21  ;;  %2805 = vtanh.f32 %v1971_v47 }
0x1a98   :  { %2807 = vtanh.f32 %v1972_v48 }
0x1aa3   :  { %v2806_v50 = vpop.eup %2805 }
0x1aa4   :  { %v1981_v51 = vmul.f32 %v2806_v50, %v3405_v49 }
0x1aa5   :  { %v2808_v52 = vpop.eup %2807 }
0x1aa6   :  { %v1983_v53 = vsel %vm358_vm3, %v1981_v51, 0.0  ;;  %v1982_v54 = vmul.f32 %v2808_v52, %v3405_v49 }
0x1aa7   :  { %1984 = vadd.xlane.f32.xlu1 %v1983_v53 }
0x1aa8   :  { %v1986_v55 = vsel %vm358_vm3, %v1982_v54, 0.0 }
0x1aa9   :  { %1987 = vadd.xlane.f32.xlu0 %v1986_v55 }
0x1b30   :  { %v1985_v59 = vpop.xlane.xlu1 %1984 }
0x1b31   :  { %v1990_v60 = vadd.f32 %v3414_v58, %v1985_v59 }
0x1b32   :  { %v1988_v61 = vpop.xlane.xlu0 %1987 }
0x1b33   :  { %v1991_v63 = vadd.f32 %v3414_v58, %v1988_v61  ;;  %v1999_v0 = vrot.slane %v1990_v60, %v3417_v57 }
0x1b35   :  { %v2003_v3 = vrot.slane %v1991_v63, %v3417_v57 }
0x1b37   :  { %v2004_v4 = vsel %vm722_vm6, %v2003_v3, %v1999_v0 }
0x1b38   :  { %v2006_v5 = vsel %vm1868_vm15, -1e+09, %v2004_v4 }
0x1b39   :  { %v2008_v6 = vsel %vm2007_vm0, %v2006_v5, -inf }
0x1b3a   :  { %2009 = vmax.xlane.f32.xlu0 %v2008_v6 }
0x1bc3   :  { %v2010_v10 = vpop.xlane.xlu0 %2009 }
0x1bc4   :  { %v2011_v12 = vsub.f32 %v2006_v5, %v2010_v10 }
0x1bc6   :  { %v2012_v7 = vmul.f32 1.442695, %v2011_v12 }
0x1bc8   :  { %2809 = vpow2.f32 %v2012_v7 }
0x1bd5   :  { %v2810_v13 = vpop.eup %2809 }
0x1bd6   :  { %v2014_v14 = vsel %vm2007_vm0, %v2810_v13, 0.0 }
0x1bd7   :  { %2015 = vadd.xlane.f32.xlu1 %v2014_v14 }
0x1c60   :  { %v2016_v11 = vpop.xlane.xlu1 %2015 }
0x1c61   :  { %2811 = vrcp.f32 %v2016_v11 }
0x1c6e   :  { %v2812_v16 = vpop.eup %2811 }
0x1c6f   :  { %v2018_v17 = vmul.f32 %v2812_v16, %v2810_v13 }
0x1c71   :  { %v2029_v8 = vrot.slane %v2018_v17, %v2028_v20  ;;  %v2022_v9 = vrot.slane %v2018_v17, %v3394_v40 }
0x1c73   :  { %2031 = vbcast.lane.b32.xlu1 %v2029_v8, 256  ;;  %2024 = vbcast.lane.b32.xlu0 %v2022_v9, 256 }
0x1ce5   :  { %v2032_v18 = vpop.permute.xlu1 %2031  ;;  %v2025_v1 = vpop.permute.xlu0 %2024 }
0x1ce6   :  { %v2034_v19 = vmul.f32 %v2032_v18, %v3318_v15  ;;  %v2033_v2 = vmul.f32 %v2025_v1, %v3321_v22  ;;  %v2671_v1 = vld [vmem:[%s3528_s21 + $0x8] sm:$0xff]  }
0x1ce7   :  { %2611 = vmatpush3.bf16.msra.mxu0 %v2671_v1 }
0x1ce8   :  { %v2042_v25 = vsel %vm358_vm3, %v2034_v19, 0.0  ;;  %v2035_v33 = vsel %vm358_vm3, %v2033_v2, 0.0  ;;  %2612 = vmatprep.subr.bf16.mxu0 %v2823_v29  ;;  %v2672_v19 = vld [vmem:[%s3528_s21] sm:$0xff]  }
0x1ce9   :  { %v2043_v34 = vrot.slane %v2042_v25, 4  ;;  %v2036_v30 = vrot.slane %v2035_v33, 4 }
0x1ceb   :  { %v2044_v28 = vadd.f32 %v2043_v34, %v2042_v25  ;;  %v2037_v24 = vadd.f32 %v2036_v30, %v2035_v33  ;;  %2613 = vmatpush3.bf16.msra.mxu0 %v2672_v19  ;;  %v2418_v19 = vld [vmem:[%s3530_s22] ss:$0 sm:$0xff] }
0x1ced   :  { %v2045_v32 = vrot.slane %v2044_v28, 2  ;;  %v2038_v37 = vrot.slane %v2037_v24, 2 }
0x1cef   :  { %v2046_v38 = vadd.f32 %v2045_v32, %v2044_v28  ;;  %v2039_v39 = vadd.f32 %v2038_v37, %v2037_v24 }
0x1cf1   :  { %v2047_v27 = vrot.slane %v2046_v38, 1  ;;  %v2040_v41 = vrot.slane %v2039_v39, 1 }
0x1cf3   :  { %v2048_v42 = vadd.f32 %v2047_v27, %v2046_v38  ;;  %v2041_v43 = vadd.f32 %v2040_v41, %v2039_v39 }
0x1cf5   :  { %v2051_v44 = vsel %vm722_vm6, %v2048_v42, %v2041_v43 }
0x1cf6   :  { %v3444_v45 = vadd.f32 %v2051_v44, %v3374_v23 }
0x1cf8   :  { %v2054_v46 = vpack.c.bf16 %v3444_v45, %v3444_v45 }
0x1cfa   :  { %2607 = vmatmul.mubr.msk.bf16.vlgmr.msra.gmra.mxu1 %vm358_vm3, %v2054_v46 }
0x1dba   :  { %v2092_v47 = vpop.f32.mrf.mxu1 }
0x1dbb   :  { %v2093_v48 = vadd.f32 %v3386_v36, %v2092_v47 }
0x1dbc   :  { %v2608_v50 = vpop.f32.mrf.mxu1 }
0x1dbd   :  { %v2105_v51 = vrot.slane %v2093_v48, %v3389_v26 }
0x1dbe   :  { %v2095_v52 = vpop.f32.mrf.mxu1 }
0x1dbf   :  { %v2106_v53 = vcombine.high %v2105_v51, %v2105_v51  ;;  %v2113_v54 = vrot.slane %v2105_v51, %v3389_v26 }
0x1dc0   :  { %v2609_v55 = vpop.f32.mrf.mxu1 }
0x1dc1   :  { %v2120_v56 = vrot.slane %v2106_v53, %v3389_v26  ;;  %v2124_v23 = vrot.slane %v2113_v54, %v3394_v40 }
0x1dc3   :  { %v2128_v59 = vrot.slane %v2120_v56, %v3394_v40  ;;  %v2131_v60 = vadd.f32 %v2124_v23, %v3331_v31 }
0x1dc5   :  { %v2132_v61 = vadd.f32 %v2128_v59, %v3333_v21  ;;  %2813 = vtanh.f32 %v2131_v60 }
0x1dc7   :  { %2815 = vtanh.f32 %v2132_v61 }
0x1dd2   :  { %v2814_v36 = vpop.eup %2813 }
0x1dd3   :  { %v2135_v63 = vmul.f32 %v2814_v36, %v3405_v49 }
0x1dd4   :  { %v2816_v0 = vpop.eup %2815 }
0x1dd5   :  { %v2137_v3 = vsel %vm358_vm3, %v2135_v63, 0.0  ;;  %v2136_v4 = vmul.f32 %v2816_v0, %v3405_v49 }
0x1dd6   :  { %2138 = vadd.xlane.f32.xlu1 %v2137_v3 }
0x1dd7   :  { %v2140_v26 = vsel %vm358_vm3, %v2136_v4, 0.0 }
0x1dd8   :  { %2141 = vadd.xlane.f32.xlu0 %v2140_v26 }
0x1e5f   :  { %v2139_v5 = vpop.xlane.xlu1 %2138 }
0x1e60   :  { %v2143_v6 = vadd.f32 %v2139_v5, %v3414_v58 }
0x1e61   :  { %v2142_v31 = vpop.xlane.xlu0 %2141 }
0x1e62   :  { %v2144_v21 = vadd.f32 %v2142_v31, %v3414_v58  ;;  %v2150_v10 = vrot.slane %v2143_v6, %v3417_v57 }
0x1e64   :  { %v2154_v12 = vrot.slane %v2144_v21, %v3417_v57 }
0x1e66   :  { %v2155_v7 = vsel %vm722_vm6, %v2154_v12, %v2150_v10 }
0x1e67   :  { %v2157_v13 = vsel %vm1868_vm15, -1e+09, %v2155_v7 }
0x1e68   :  { %v2158_v49 = vsel %vm2007_vm0, %v2157_v13, -inf }
0x1e69   :  { %2159 = vmax.xlane.f32.xlu0 %v2158_v49 }
0x1ef2   :  { %v2160_v14 = vpop.xlane.xlu0 %2159 }
0x1ef3   :  { %v2161_v11 = vsub.f32 %v2157_v13, %v2160_v14 }
0x1ef5   :  { %v2162_v16 = vmul.f32 1.442695, %v2161_v11 }
0x1ef7   :  { %2817 = vpow2.f32 %v2162_v16 }
0x1f04   :  { %v2818_v17 = vpop.eup %2817 }
0x1f05   :  { %v2164_v8 = vsel %vm2007_vm0, %v2818_v17, 0.0 }
0x1f06   :  { %2165 = vadd.xlane.f32.xlu1 %v2164_v8 }
0x1f8f   :  { %v2166_v58 = vpop.xlane.xlu1 %2165 }
0x1f90   :  { %2819 = vrcp.f32 %v2166_v58 }
0x1f9d   :  { %v2820_v9 = vpop.eup %2819 }
0x1f9e   :  { %v3470_v57 = vmul.f32 %v2820_v9, %v2818_v17 }
0x1fa0   :  { %v2179_v62 = vrot.slane %v3470_v57, %v2028_v20  ;;  %v2172_v18 = vrot.slane %v3470_v57, %v3394_v40  ;;  %v2205_v20 = vld [vmem:[%s3529_s4 + $0x8] sm:$0xff]  ;;  %v2204_v40 = vld [vmem:[%s3529_s4] sm:$0xff] }
0x1fa1   :  { %v2208_v2 = vunpack.c.l.bf16 %v2205_v20  ;;  %v2209_v25 = vunpack.c.h.bf16 %v2205_v20  ;;  %v2206_v33 = vunpack.c.l.bf16 %v2204_v40  ;;  %v2207_v34 = vunpack.c.h.bf16 %v2204_v40 }
0x1fa2   :  { %2181 = vbcast.lane.b32.xlu1 %v2179_v62, 256  ;;  %2174 = vbcast.lane.b32.xlu0 %v2172_v18, 256  ;;  %v2830_v18 = vmov 1983009808  }
0x1fa3   :  { %v2319_v1 = vunpack.c.l.s4 %v2830_v18 }
0x1fa5   :  { %v2320_v20 = vunpack.c.0.s8 %v2319_v1 }
0x2014   :  { %v2182_v30 = vpop.permute.xlu1 %2181  ;;  %v2175_v28 = vpop.permute.xlu0 %2174 }
0x2015   :  { %v2184_v29 = vmul.f32 %v2182_v30, %v3318_v15  ;;  %v2212_v24 = vmul.f32 %v2208_v2, %v2182_v30  ;;  %v2213_v32 = vmul.f32 %v2209_v25, %v2182_v30  ;;  %v2183_v37 = vmul.f32 %v2175_v28, %v3321_v22 }
0x2016   :  { %v2210_v38 = vmul.f32 %v2206_v33, %v2175_v28  ;;  %v2211_v39 = vmul.f32 %v2207_v34, %v2175_v28  ;;  %v2323_v25 = vsub.s32 %v2320_v20, %v3381_v35 }
0x2017   :  { %v2192_v27 = vsel %vm358_vm3, %v2184_v29, 0.0  ;;  %v2226_v41 = vrot.slane %v2212_v24, 4  ;;  %v2232_v42 = vrot.slane %v2213_v32, 4  ;;  %v2185_v43 = vsel %vm358_vm3, %v2183_v37, 0.0 }
0x2018   :  { %v2193_v44 = vrot.slane %v2192_v27, 4  ;;  %v2186_v46 = vrot.slane %v2185_v43, 4  ;;  %v2214_v47 = vrot.slane %v2210_v38, 4  ;;  %v2220_v48 = vrot.slane %v2211_v39, 4 }
0x2019   :  { %v2227_v50 = vadd.f32 %v2226_v41, %v2212_v24  ;;  %v2233_v51 = vadd.f32 %v2232_v42, %v2213_v32 }
0x201a   :  { %v2194_v52 = vadd.f32 %v2193_v44, %v2192_v27  ;;  %v2187_v15 = vadd.f32 %v2186_v46, %v2185_v43  ;;  %v2215_v53 = vadd.f32 %v2214_v47, %v2210_v38  ;;  %v2221_v54 = vadd.f32 %v2220_v48, %v2211_v39 }
0x201b   :  { %v2228_v55 = vrot.slane %v2227_v50, 2  ;;  %v2234_v22 = vrot.slane %v2233_v51, 2 }
0x201c   :  { %v2195_v56 = vrot.slane %v2194_v52, 2  ;;  %v2188_v23 = vrot.slane %v2187_v15, 2  ;;  %v2216_v59 = vrot.slane %v2215_v53, 2  ;;  %v2222_v60 = vrot.slane %v2221_v54, 2 }
0x201d   :  { %v2229_v61 = vadd.f32 %v2228_v55, %v2227_v50  ;;  %v2235_v36 = vadd.f32 %v2234_v22, %v2233_v51 }
0x201e   :  { %v2196_v63 = vadd.f32 %v2195_v56, %v2194_v52  ;;  %v2189_v0 = vadd.f32 %v2188_v23, %v2187_v15  ;;  %v2217_v3 = vadd.f32 %v2216_v59, %v2215_v53  ;;  %v2223_v4 = vadd.f32 %v2222_v60, %v2221_v54 }
0x201f   :  { %v2230_v26 = vrot.slane %v2229_v61, 1  ;;  %v2236_v5 = vrot.slane %v2235_v36, 1 }
0x2020   :  { %v2197_v6 = vrot.slane %v2196_v63, 1  ;;  %v2190_v31 = vrot.slane %v2189_v0, 1  ;;  %v2218_v21 = vrot.slane %v2217_v3, 1  ;;  %v2224_v10 = vrot.slane %v2223_v4, 1 }
0x2021   :  { %v2231_v12 = vadd.f32 %v2230_v26, %v2229_v61  ;;  %v2237_v7 = vadd.f32 %v2236_v5, %v2235_v36 }
0x2022   :  { %v2198_v13 = vadd.f32 %v2197_v6, %v2196_v63  ;;  %v2191_v49 = vadd.f32 %v2190_v31, %v2189_v0  ;;  %v2219_v14 = vadd.f32 %v2218_v21, %v2217_v3  ;;  %v2225_v11 = vadd.f32 %v2224_v10, %v2223_v4 }
0x2024   :  { %v2201_v16 = vsel %vm722_vm6, %v2198_v13, %v2191_v49  ;;  %v2309_v17 = vsel %vm722_vm6, %v2231_v12, %v2219_v14  ;;  %v2310_v8 = vsel %vm722_vm6, %v2237_v7, %v2225_v11 }
0x2025   :  { %v2203_v58 = vadd.f32 %v2201_v16, %v3444_v45  ;;  %v2317_v9 = vcombine.low %v2309_v17, %v2310_v8  ;;  %v2313_v45 = vsel %vm256_vm2, %v3470_v57, 0.0 }
0x2027   :  { %v2238_v62 = vpack.c.bf16 %v2203_v58, %v2203_v58  ;;  %v2331_v24 = vrot.slane %v2317_v9, %v2323_v25 }
0x2029   :  { %2615 = vmatmul.mubr.msk.bf16.vlgmr.msra.gmra.mxu0 %vm358_vm3, %v2238_v62 }
0x20e9   :  { %v2299_v40 = vpop.f32.mrf.mxu0 }
0x20ea   :  { %v2300_v2 = vadd.f32 %v2418_v19, %v2299_v40 }
0x20eb   :  { %v2616_v33 = vpop.f32.mrf.mxu0 }
0x20ec   :  { %v2312_v34 = vsel %vm2311_vm1, %v2300_v2, 0.0 }
0x20ed   :  { %v2316_v30 = vcombine.low %v2312_v34, %v2313_v45  ;;  %v2302_v28 = vpop.f32.mrf.mxu0 }
0x20ef   :  { %v2324_v29 = vrot.slane %v2316_v30, %v2323_v25  ;;  %v2617_v32 = vpop.f32.mrf.mxu0 }
0x20f1   :  { %v2332_v37 = vcombine.low %v2324_v29, %v2331_v24 }
0x20f3   :  { %2334 = vst [vmem:[%s3531_s23] sm:$0xff] %v2332_v37 }

</bundles_post_ra>
